<compile_context>
chip_gen: v6e
topology: v6e:2x2x1
jax: 0.10.0
libtpu: 0.0.40
codegen_flags: <defaults>
</compile_context>

<pallas_src>
import math

import jax
import jax.numpy as jnp
import numpy as np
from jax import lax
from jax.experimental import pallas as pl
from jax.experimental.pallas import tpu as pltpu  # noqa: F401

B, S, D = 2, 8, 32       # batch, seq, d_model (EncoderLayer "size")
H = 4                    # attention heads
DK = D // H
DFF = 64                 # feed-forward hidden dim
EPS = 1e-6
NEG_INF = -1e9

# Row indices inside the packed `vecs` operand (every row is a (1, D) vector).
_LN1_A, _LN1_B, _LN2_A, _LN2_B, _BO, _B2, _BVO0 = 0, 1, 2, 3, 4, 5, 6
_N_VEC = _BVO0 + H       # 10 rows


def _layer_norm(x, a, b):
    # a * (x - mean) / (std + eps) + b, unbiased std (torch.std default).
    mean = jnp.mean(x, axis=-1, keepdims=True)
    diff = x - mean
    var = jnp.sum(diff * diff, axis=-1, keepdims=True) * (1.0 / (x.shape[-1] - 1))
    # exact reciprocal here (tighter parity with the PyTorch reference)
    return a * (diff / (jnp.sqrt(var) + EPS)) + b


def encoder_layer_kernel(x_ref, bias_ref, wqk_ref, bqk_ref, wvo_ref,
                         vecs_ref, w1b1_ref, w2_ref, o_ref):
    x = x_ref[...]                 # (B*S, D) — both batches as one slab
    bias = bias_ref[...]           # (B*S, B*S) additive mask bias: 0 keep, -1e9 masked
    n = x.shape[0]

    vecs = vecs_ref[...]           # (10, D) packed (1, D) vectors
    ln1_a = vecs[_LN1_A:_LN1_A + 1, :]
    ln1_b = vecs[_LN1_B:_LN1_B + 1, :]
    ln2_a = vecs[_LN2_A:_LN2_A + 1, :]
    ln2_b = vecs[_LN2_B:_LN2_B + 1, :]
    bo = vecs[_BO:_BO + 1, :]
    b2 = vecs[_B2:_B2 + 1, :]

    # ---- sublayer 0: x + self_attn(LN(x), LN(x), LN(x), mask) ----
    xn = _layer_norm(x, ln1_a, ln1_b)

    attn = jnp.broadcast_to(bo, (n, D))      # accumulator seeded with out-proj bias
    for h in range(H):                       # static unroll; only leading-axis Ref indexing
        # q-projection weights/bias already scaled by 1/sqrt(dk) in the wrapper
        qh = jnp.dot(xn, wqk_ref[h], preferred_element_type=jnp.float32) + bqk_ref[h]
        kh = jnp.dot(xn, wqk_ref[H + h], preferred_element_type=jnp.float32) + bqk_ref[H + h]
        # wo folded into wv in the wrapper:  vh == (xn @ wv_h + bv_h) @ wo_h
        vh = (jnp.dot(xn, wvo_ref[h], preferred_element_type=jnp.float32)
              + vecs[_BVO0 + h:_BVO0 + h + 1, :])
        # q @ k^T without materializing a transpose (contract last dims)
        s = lax.dot_general(qh, kh, (((1,), (1,)), ((), ())),
                            preferred_element_type=jnp.float32) + bias       # (B*S, B*S)
        s = s - jnp.max(s, axis=-1, keepdims=True)
        p = jnp.exp(s)
        p = p * pl.reciprocal(jnp.sum(p, axis=-1, keepdims=True), approx=True)
        attn = attn + jnp.dot(p, vh, preferred_element_type=jnp.float32)     # K=16, N=D
    x1 = x + attn                            # dropout == identity (eval / p=0)

    # ---- sublayer 1: x1 + feed_forward(LN(x1)) ----
    xn2 = _layer_norm(x1, ln2_a, ln2_b)
    w1 = w1b1_ref[:D, :]
    b1 = w1b1_ref[D:D + 1, :]
    hid = jnp.maximum(jnp.dot(xn2, w1, preferred_element_type=jnp.float32) + b1, 0.0)
    ffn = jnp.dot(hid, w2_ref[...], preferred_element_type=jnp.float32) + b2
    o_ref[...] = x1 + ffn


@jax.jit
def encoder_layer(x, mask, params):
    b, s, d = x.shape
    n = b * s
    x2 = x.reshape(n, d)

    # Additive attention bias flattened to (B*S, B*S): 0 where query i may attend key j
    # (same batch & mask keeps it), -1e9 otherwise (masked or cross-batch).
    keep_bias = jnp.where(mask > 0, 0.0, NEG_INF).astype(jnp.float32)        # (B, S, S)
    bids = jnp.arange(b)
    same_batch = bids[:, None, None, None] == bids[None, None, :, None]      # (B, 1, B, 1)
    attn_bias = jnp.where(same_batch, keep_bias[:, :, None, :], NEG_INF)     # (B, S, B, S)
    attn_bias = attn_bias.reshape(n, n)

    # Per-head weight layout with head on a LEADING axis (free in-kernel indexing).
    scale = 1.0 / math.sqrt(DK)
    wq_h = (params["wq"] * scale).reshape(d, H, DK).transpose(1, 0, 2)       # (H, D, DK)
    wk_h = params["wk"].reshape(d, H, DK).transpose(1, 0, 2)                 # (H, D, DK)
    bq_h = (params["bq"] * scale).reshape(H, 1, DK)
    bk_h = params["bk"].reshape(H, 1, DK)
    wqk = jnp.concatenate([wq_h, wk_h], axis=0)                              # (2H, D, DK)
    bqk = jnp.concatenate([bq_h, bk_h], axis=0)                              # (2H, 1, DK)

    # Fold the output projection into the value projection per head:
    #   ctx_h @ wo_h == p_h @ (xn @ (wv_h @ wo_h) + bv_h @ wo_h)
    wv_h = params["wv"].reshape(d, H, DK).transpose(1, 0, 2)                 # (H, D, DK)
    wo_h = params["wo"].reshape(H, DK, d)                                    # (H, DK, D)
    wvo = jnp.einsum("hdk,hke->hde", wv_h, wo_h)                             # (H, D, D)
    bvo = jnp.einsum("hk,hkd->hd", params["bv"].reshape(H, DK), wo_h)        # (H, D)

    # Pack all (1, D) vectors into a single operand (one DMA instead of ten).
    vecs = jnp.concatenate(
        [params["ln1_a"], params["ln1_b"], params["ln2_a"], params["ln2_b"],
         params["bo"], params["b2"], bvo], axis=0)                           # (10, D)

    w1b1 = jnp.concatenate([params["w1"], params["b1"]], axis=0)             # (D+1, DFF)

    out = pl.pallas_call(
        encoder_layer_kernel,
        out_shape=jax.ShapeDtypeStruct((n, d), jnp.float32),
    )(x2, attn_bias, wqk, bqk, wvo, vecs, w1b1, params["w2"])
    return out.reshape(b, s, d)


def ref_forward(x, mask, p):
    """Pure-JAX reference of the same forward pass (for correctness check)."""
    def ln(z, a, b):
        mean = jnp.mean(z, -1, keepdims=True)
        var = jnp.sum((z - mean) ** 2, -1, keepdims=True) / (D - 1)
        return a * (z - mean) / (jnp.sqrt(var) + EPS) + b

    xn = ln(x, p["ln1_a"], p["ln1_b"])
    q = xn @ p["wq"] + p["bq"]
    k = xn @ p["wk"] + p["bk"]
    v = xn @ p["wv"] + p["bv"]
    qh = q.reshape(B, S, H, DK)
    kh = k.reshape(B, S, H, DK)
    vh = v.reshape(B, S, H, DK)
    s = jnp.einsum("bqhd,bkhd->bhqk", qh, kh) / math.sqrt(DK)
    s = jnp.where(mask[:, None, :, :] == 0, -1e9, s)
    pr = jax.nn.softmax(s, axis=-1)
    ctx = jnp.einsum("bhqk,bkhd->bqhd", pr, vh).reshape(B, S, D)
    x1 = x + ctx @ p["wo"] + p["bo"]
    xn2 = ln(x1, p["ln2_a"], p["ln2_b"])
    return x1 + jnp.maximum(xn2 @ p["w1"] + p["b1"], 0.0) @ p["w2"] + p["b2"]


def make_params(key):
    keys = jax.random.split(key, 12)
    scale = 0.05
    return {
        "ln1_a": jnp.ones((1, D), jnp.float32),
        "ln1_b": jnp.zeros((1, D), jnp.float32),
        "ln2_a": jnp.ones((1, D), jnp.float32),
        "ln2_b": jnp.zeros((1, D), jnp.float32),
        "wq": scale * jax.random.normal(keys[0], (D, D), jnp.float32),
        "bq": scale * jax.random.normal(keys[1], (1, D), jnp.float32),
        "wk": scale * jax.random.normal(keys[2], (D, D), jnp.float32),
        "bk": scale * jax.random.normal(keys[3], (1, D), jnp.float32),
        "wv": scale * jax.random.normal(keys[4], (D, D), jnp.float32),
        "bv": scale * jax.random.normal(keys[5], (1, D), jnp.float32),
        "wo": scale * jax.random.normal(keys[6], (D, D), jnp.float32),
        "bo": scale * jax.random.normal(keys[7], (1, D), jnp.float32),
        "w1": scale * jax.random.normal(keys[8], (D, DFF), jnp.float32),
        "b1": scale * jax.random.normal(keys[9], (1, DFF), jnp.float32),
        "w2": scale * jax.random.normal(keys[10], (DFF, D), jnp.float32),
        "b2": scale * jax.random.normal(keys[11], (1, D), jnp.float32),
    }


if __name__ == "__main__":
    key = jax.random.PRNGKey(0)
    k_x, k_p = jax.random.split(key)

    x = jax.random.normal(k_x, (B, S, D), jnp.float32)

    # Padding-style mask: batch 0 attends to all 8 keys, batch 1 only to first 6.
    lengths = jnp.array([S, 6])
    key_valid = (jnp.arange(S)[None, :] < lengths[:, None]).astype(jnp.float32)  # (B, S)
    mask = jnp.broadcast_to(key_valid[:, None, :], (B, S, S)).astype(jnp.float32)

    params = make_params(k_p)

    out = encoder_layer(x, mask, params)
    out = jax.block_until_ready(out)

    ref = ref_forward(x, mask, params)
    # tolerance covers the EUP approx reciprocal in softmax and the (exact-arithmetic-
    # equivalent) wv@wo / 1/sqrt(dk) refactorings done in f32
    np.testing.assert_allclose(np.asarray(out), np.asarray(ref), rtol=2e-3, atol=2e-3)

    print("KERNEL_OK")
</pallas_src>

<mosaic_0001>
module attributes {stable_mosaic.version = 11 : i64} {
  func.func @encoder_layer_kernel(%arg0: memref<16x32xf32, #tpu.memory_space<vmem>>, %arg1: memref<16x16xf32, #tpu.memory_space<vmem>>, %arg2: memref<8x32x8xf32, #tpu.memory_space<vmem>>, %arg3: memref<8x1x8xf32, #tpu.memory_space<vmem>>, %arg4: memref<4x32x32xf32, #tpu.memory_space<vmem>>, %arg5: memref<10x32xf32, #tpu.memory_space<vmem>>, %arg6: memref<33x64xf32, #tpu.memory_space<vmem>>, %arg7: memref<64x32xf32, #tpu.memory_space<vmem>>, %arg8: memref<16x32xf32, #tpu.memory_space<vmem>>) attributes {dimension_semantics = [], scalar_prefetch = 0 : i64, scratch_operands = 0 : i64, tpu.core_type = #tpu.core_type<tc>} {
    %c0 = arith.constant 0 : index
    %c0_0 = arith.constant 0 : index
    %0 = vector.load %arg0[%c0, %c0_0] : memref<16x32xf32, #tpu.memory_space<vmem>>, vector<16x32xf32>
    %c0_1 = arith.constant 0 : index
    %c0_2 = arith.constant 0 : index
    %1 = vector.load %arg1[%c0_1, %c0_2] : memref<16x16xf32, #tpu.memory_space<vmem>>, vector<16x16xf32>
    %c0_3 = arith.constant 0 : index
    %c0_4 = arith.constant 0 : index
    %2 = vector.load %arg5[%c0_3, %c0_4] : memref<10x32xf32, #tpu.memory_space<vmem>>, vector<10x32xf32>
    %3 = vector.extract_strided_slice %2 {offsets = [0, 0], sizes = [1, 32], strides = [1, 1]} : vector<10x32xf32> to vector<1x32xf32>
    %4 = vector.extract_strided_slice %2 {offsets = [1, 0], sizes = [1, 32], strides = [1, 1]} : vector<10x32xf32> to vector<1x32xf32>
    %5 = vector.extract_strided_slice %2 {offsets = [2, 0], sizes = [1, 32], strides = [1, 1]} : vector<10x32xf32> to vector<1x32xf32>
    %6 = vector.extract_strided_slice %2 {offsets = [3, 0], sizes = [1, 32], strides = [1, 1]} : vector<10x32xf32> to vector<1x32xf32>
    %7 = vector.extract_strided_slice %2 {offsets = [4, 0], sizes = [1, 32], strides = [1, 1]} : vector<10x32xf32> to vector<1x32xf32>
    %8 = vector.extract_strided_slice %2 {offsets = [5, 0], sizes = [1, 32], strides = [1, 1]} : vector<10x32xf32> to vector<1x32xf32>
    %cst = arith.constant dense<0.000000e+00> : vector<16xf32>
    %9 = vector.multi_reduction <add>, %0, %cst [1] : vector<16x32xf32> to vector<16xf32>
    %10 = vector.shape_cast %9 : vector<16xf32> to vector<16x1xf32>
    %cst_5 = arith.constant 3.200000e+01 : f32
    %11 = vector.broadcast %cst_5 : f32 to vector<16x1xf32>
    %12 = arith.divf %10, %11 : vector<16x1xf32>
    %13 = vector.broadcast %12 : vector<16x1xf32> to vector<16x32xf32>
    %14 = arith.subf %0, %13 : vector<16x32xf32>
    %15 = arith.mulf %14, %14 : vector<16x32xf32>
    %cst_6 = arith.constant dense<0.000000e+00> : vector<16xf32>
    %16 = vector.multi_reduction <add>, %15, %cst_6 [1] : vector<16x32xf32> to vector<16xf32>
    %17 = vector.shape_cast %16 : vector<16xf32> to vector<16x1xf32>
    %cst_7 = arith.constant 0.0322580636 : f32
    %18 = vector.broadcast %cst_7 : f32 to vector<16x1xf32>
    %19 = arith.mulf %17, %18 : vector<16x1xf32>
    %20 = math.sqrt %19 : vector<16x1xf32>
    %cst_8 = arith.constant 9.99999997E-7 : f32
    %21 = vector.broadcast %cst_8 : f32 to vector<16x1xf32>
    %22 = arith.addf %20, %21 : vector<16x1xf32>
    %23 = vector.broadcast %22 : vector<16x1xf32> to vector<16x32xf32>
    %24 = arith.divf %14, %23 : vector<16x32xf32>
    %25 = vector.broadcast %3 : vector<1x32xf32> to vector<16x32xf32>
    %26 = arith.mulf %25, %24 : vector<16x32xf32>
    %27 = vector.broadcast %4 : vector<1x32xf32> to vector<16x32xf32>
    %28 = arith.addf %26, %27 : vector<16x32xf32>
    %29 = vector.shape_cast %7 : vector<1x32xf32> to vector<1x32xf32>
    %30 = vector.broadcast %29 : vector<1x32xf32> to vector<16x32xf32>
    %c0_9 = arith.constant 0 : index
    %c0_10 = arith.constant 0 : index
    %c0_11 = arith.constant 0 : index
    %31 = vector.load %arg2[%c0_9, %c0_10, %c0_11] : memref<8x32x8xf32, #tpu.memory_space<vmem>>, vector<1x32x8xf32>
    %32 = vector.shape_cast %31 : vector<1x32x8xf32> to vector<32x8xf32>
    %cst_12 = arith.constant dense<0.000000e+00> : vector<16x8xf32>
    %33 = tpu.matmul %28, %32, %cst_12 {dimension_numbers = #tpu.dot_dimension_numbers<[1], [0], [0], [1], [0, 0, 1, 1], [], []>} : vector<16x32xf32>, vector<32x8xf32>, vector<16x8xf32> -> vector<16x8xf32>
    %c0_13 = arith.constant 0 : index
    %c0_14 = arith.constant 0 : index
    %c0_15 = arith.constant 0 : index
    %34 = vector.load %arg3[%c0_13, %c0_14, %c0_15] : memref<8x1x8xf32, #tpu.memory_space<vmem>>, vector<1x1x8xf32>
    %35 = vector.shape_cast %34 : vector<1x1x8xf32> to vector<1x8xf32>
    %36 = vector.broadcast %35 : vector<1x8xf32> to vector<16x8xf32>
    %37 = arith.addf %33, %36 : vector<16x8xf32>
    %c4 = arith.constant 4 : index
    %c0_16 = arith.constant 0 : index
    %c0_17 = arith.constant 0 : index
    %38 = vector.load %arg2[%c4, %c0_16, %c0_17] : memref<8x32x8xf32, #tpu.memory_space<vmem>>, vector<1x32x8xf32>
    %39 = vector.shape_cast %38 : vector<1x32x8xf32> to vector<32x8xf32>
    %cst_18 = arith.constant dense<0.000000e+00> : vector<16x8xf32>
    %40 = tpu.matmul %28, %39, %cst_18 {dimension_numbers = #tpu.dot_dimension_numbers<[1], [0], [0], [1], [0, 0, 1, 1], [], []>} : vector<16x32xf32>, vector<32x8xf32>, vector<16x8xf32> -> vector<16x8xf32>
    %c4_19 = arith.constant 4 : index
    %c0_20 = arith.constant 0 : index
    %c0_21 = arith.constant 0 : index
    %41 = vector.load %arg3[%c4_19, %c0_20, %c0_21] : memref<8x1x8xf32, #tpu.memory_space<vmem>>, vector<1x1x8xf32>
    %42 = vector.shape_cast %41 : vector<1x1x8xf32> to vector<1x8xf32>
    %43 = vector.broadcast %42 : vector<1x8xf32> to vector<16x8xf32>
    %44 = arith.addf %40, %43 : vector<16x8xf32>
    %c0_22 = arith.constant 0 : index
    %c0_23 = arith.constant 0 : index
    %c0_24 = arith.constant 0 : index
    %45 = vector.load %arg4[%c0_22, %c0_23, %c0_24] : memref<4x32x32xf32, #tpu.memory_space<vmem>>, vector<1x32x32xf32>
    %46 = vector.shape_cast %45 : vector<1x32x32xf32> to vector<32x32xf32>
    %cst_25 = arith.constant dense<0.000000e+00> : vector<16x32xf32>
    %47 = tpu.matmul %28, %46, %cst_25 {dimension_numbers = #tpu.dot_dimension_numbers<[1], [0], [0], [1], [0, 0, 1, 1], [], []>} : vector<16x32xf32>, vector<32x32xf32>, vector<16x32xf32> -> vector<16x32xf32>
    %48 = vector.extract_strided_slice %2 {offsets = [6, 0], sizes = [1, 32], strides = [1, 1]} : vector<10x32xf32> to vector<1x32xf32>
    %49 = vector.broadcast %48 : vector<1x32xf32> to vector<16x32xf32>
    %50 = arith.addf %47, %49 : vector<16x32xf32>
    %cst_26 = arith.constant dense<0.000000e+00> : vector<16x16xf32>
    %51 = tpu.matmul %37, %44, %cst_26 {dimension_numbers = #tpu.dot_dimension_numbers<[1], [1], [0], [0], [0, 0, 1, 0], [], []>} : vector<16x8xf32>, vector<16x8xf32>, vector<16x16xf32> -> vector<16x16xf32>
    %52 = arith.addf %51, %1 : vector<16x16xf32>
    %cst_27 = arith.constant dense<0xFF800000> : vector<16xf32>
    %53 = vector.multi_reduction <maximumf>, %52, %cst_27 [1] : vector<16x16xf32> to vector<16xf32>
    %54 = vector.shape_cast %53 : vector<16xf32> to vector<16x1xf32>
    %55 = vector.broadcast %54 : vector<16x1xf32> to vector<16x16xf32>
    %56 = arith.subf %52, %55 : vector<16x16xf32>
    %57 = math.exp %56 : vector<16x16xf32>
    %cst_28 = arith.constant dense<0.000000e+00> : vector<16xf32>
    %58 = vector.multi_reduction <add>, %57, %cst_28 [1] : vector<16x16xf32> to vector<16xf32>
    %59 = vector.shape_cast %58 : vector<16xf32> to vector<16x1xf32>
    %60 = tpu.reciprocal %59 {approx = true} : vector<16x1xf32> -> vector<16x1xf32>
    %61 = vector.broadcast %60 : vector<16x1xf32> to vector<16x16xf32>
    %62 = arith.mulf %57, %61 : vector<16x16xf32>
    %cst_29 = arith.constant dense<0.000000e+00> : vector<16x32xf32>
    %63 = tpu.matmul %62, %50, %cst_29 {dimension_numbers = #tpu.dot_dimension_numbers<[1], [0], [0], [1], [0, 0, 1, 1], [], []>} : vector<16x16xf32>, vector<16x32xf32>, vector<16x32xf32> -> vector<16x32xf32>
    %64 = arith.addf %30, %63 : vector<16x32xf32>
    %c1 = arith.constant 1 : index
    %c0_30 = arith.constant 0 : index
    %c0_31 = arith.constant 0 : index
    %65 = vector.load %arg2[%c1, %c0_30, %c0_31] : memref<8x32x8xf32, #tpu.memory_space<vmem>>, vector<1x32x8xf32>
    %66 = vector.shape_cast %65 : vector<1x32x8xf32> to vector<32x8xf32>
    %cst_32 = arith.constant dense<0.000000e+00> : vector<16x8xf32>
    %67 = tpu.matmul %28, %66, %cst_32 {dimension_numbers = #tpu.dot_dimension_numbers<[1], [0], [0], [1], [0, 0, 1, 1], [], []>} : vector<16x32xf32>, vector<32x8xf32>, vector<16x8xf32> -> vector<16x8xf32>
    %c1_33 = arith.constant 1 : index
    %c0_34 = arith.constant 0 : index
    %c0_35 = arith.constant 0 : index
    %68 = vector.load %arg3[%c1_33, %c0_34, %c0_35] : memref<8x1x8xf32, #tpu.memory_space<vmem>>, vector<1x1x8xf32>
    %69 = vector.shape_cast %68 : vector<1x1x8xf32> to vector<1x8xf32>
    %70 = vector.broadcast %69 : vector<1x8xf32> to vector<16x8xf32>
    %71 = arith.addf %67, %70 : vector<16x8xf32>
    %c5 = arith.constant 5 : index
    %c0_36 = arith.constant 0 : index
    %c0_37 = arith.constant 0 : index
    %72 = vector.load %arg2[%c5, %c0_36, %c0_37] : memref<8x32x8xf32, #tpu.memory_space<vmem>>, vector<1x32x8xf32>
    %73 = vector.shape_cast %72 : vector<1x32x8xf32> to vector<32x8xf32>
    %cst_38 = arith.constant dense<0.000000e+00> : vector<16x8xf32>
    %74 = tpu.matmul %28, %73, %cst_38 {dimension_numbers = #tpu.dot_dimension_numbers<[1], [0], [0], [1], [0, 0, 1, 1], [], []>} : vector<16x32xf32>, vector<32x8xf32>, vector<16x8xf32> -> vector<16x8xf32>
    %c5_39 = arith.constant 5 : index
    %c0_40 = arith.constant 0 : index
    %c0_41 = arith.constant 0 : index
    %75 = vector.load %arg3[%c5_39, %c0_40, %c0_41] : memref<8x1x8xf32, #tpu.memory_space<vmem>>, vector<1x1x8xf32>
    %76 = vector.shape_cast %75 : vector<1x1x8xf32> to vector<1x8xf32>
    %77 = vector.broadcast %76 : vector<1x8xf32> to vector<16x8xf32>
    %78 = arith.addf %74, %77 : vector<16x8xf32>
    %c1_42 = arith.constant 1 : index
    %c0_43 = arith.constant 0 : index
    %c0_44 = arith.constant 0 : index
    %79 = vector.load %arg4[%c1_42, %c0_43, %c0_44] : memref<4x32x32xf32, #tpu.memory_space<vmem>>, vector<1x32x32xf32>
    %80 = vector.shape_cast %79 : vector<1x32x32xf32> to vector<32x32xf32>
    %cst_45 = arith.constant dense<0.000000e+00> : vector<16x32xf32>
    %81 = tpu.matmul %28, %80, %cst_45 {dimension_numbers = #tpu.dot_dimension_numbers<[1], [0], [0], [1], [0, 0, 1, 1], [], []>} : vector<16x32xf32>, vector<32x32xf32>, vector<16x32xf32> -> vector<16x32xf32>
    %82 = vector.extract_strided_slice %2 {offsets = [7, 0], sizes = [1, 32], strides = [1, 1]} : vector<10x32xf32> to vector<1x32xf32>
    %83 = vector.broadcast %82 : vector<1x32xf32> to vector<16x32xf32>
    %84 = arith.addf %81, %83 : vector<16x32xf32>
    %cst_46 = arith.constant dense<0.000000e+00> : vector<16x16xf32>
    %85 = tpu.matmul %71, %78, %cst_46 {dimension_numbers = #tpu.dot_dimension_numbers<[1], [1], [0], [0], [0, 0, 1, 0], [], []>} : vector<16x8xf32>, vector<16x8xf32>, vector<16x16xf32> -> vector<16x16xf32>
    %86 = arith.addf %85, %1 : vector<16x16xf32>
    %cst_47 = arith.constant dense<0xFF800000> : vector<16xf32>
    %87 = vector.multi_reduction <maximumf>, %86, %cst_47 [1] : vector<16x16xf32> to vector<16xf32>
    %88 = vector.shape_cast %87 : vector<16xf32> to vector<16x1xf32>
    %89 = vector.broadcast %88 : vector<16x1xf32> to vector<16x16xf32>
    %90 = arith.subf %86, %89 : vector<16x16xf32>
    %91 = math.exp %90 : vector<16x16xf32>
    %cst_48 = arith.constant dense<0.000000e+00> : vector<16xf32>
    %92 = vector.multi_reduction <add>, %91, %cst_48 [1] : vector<16x16xf32> to vector<16xf32>
    %93 = vector.shape_cast %92 : vector<16xf32> to vector<16x1xf32>
    %94 = tpu.reciprocal %93 {approx = true} : vector<16x1xf32> -> vector<16x1xf32>
    %95 = vector.broadcast %94 : vector<16x1xf32> to vector<16x16xf32>
    %96 = arith.mulf %91, %95 : vector<16x16xf32>
    %cst_49 = arith.constant dense<0.000000e+00> : vector<16x32xf32>
    %97 = tpu.matmul %96, %84, %cst_49 {dimension_numbers = #tpu.dot_dimension_numbers<[1], [0], [0], [1], [0, 0, 1, 1], [], []>} : vector<16x16xf32>, vector<16x32xf32>, vector<16x32xf32> -> vector<16x32xf32>
    %98 = arith.addf %64, %97 : vector<16x32xf32>
    %c2 = arith.constant 2 : index
    %c0_50 = arith.constant 0 : index
    %c0_51 = arith.constant 0 : index
    %99 = vector.load %arg2[%c2, %c0_50, %c0_51] : memref<8x32x8xf32, #tpu.memory_space<vmem>>, vector<1x32x8xf32>
    %100 = vector.shape_cast %99 : vector<1x32x8xf32> to vector<32x8xf32>
    %cst_52 = arith.constant dense<0.000000e+00> : vector<16x8xf32>
    %101 = tpu.matmul %28, %100, %cst_52 {dimension_numbers = #tpu.dot_dimension_numbers<[1], [0], [0], [1], [0, 0, 1, 1], [], []>} : vector<16x32xf32>, vector<32x8xf32>, vector<16x8xf32> -> vector<16x8xf32>
    %c2_53 = arith.constant 2 : index
    %c0_54 = arith.constant 0 : index
    %c0_55 = arith.constant 0 : index
    %102 = vector.load %arg3[%c2_53, %c0_54, %c0_55] : memref<8x1x8xf32, #tpu.memory_space<vmem>>, vector<1x1x8xf32>
    %103 = vector.shape_cast %102 : vector<1x1x8xf32> to vector<1x8xf32>
    %104 = vector.broadcast %103 : vector<1x8xf32> to vector<16x8xf32>
    %105 = arith.addf %101, %104 : vector<16x8xf32>
    %c6 = arith.constant 6 : index
    %c0_56 = arith.constant 0 : index
    %c0_57 = arith.constant 0 : index
    %106 = vector.load %arg2[%c6, %c0_56, %c0_57] : memref<8x32x8xf32, #tpu.memory_space<vmem>>, vector<1x32x8xf32>
    %107 = vector.shape_cast %106 : vector<1x32x8xf32> to vector<32x8xf32>
    %cst_58 = arith.constant dense<0.000000e+00> : vector<16x8xf32>
    %108 = tpu.matmul %28, %107, %cst_58 {dimension_numbers = #tpu.dot_dimension_numbers<[1], [0], [0], [1], [0, 0, 1, 1], [], []>} : vector<16x32xf32>, vector<32x8xf32>, vector<16x8xf32> -> vector<16x8xf32>
    %c6_59 = arith.constant 6 : index
    %c0_60 = arith.constant 0 : index
    %c0_61 = arith.constant 0 : index
    %109 = vector.load %arg3[%c6_59, %c0_60, %c0_61] : memref<8x1x8xf32, #tpu.memory_space<vmem>>, vector<1x1x8xf32>
    %110 = vector.shape_cast %109 : vector<1x1x8xf32> to vector<1x8xf32>
    %111 = vector.broadcast %110 : vector<1x8xf32> to vector<16x8xf32>
    %112 = arith.addf %108, %111 : vector<16x8xf32>
    %c2_62 = arith.constant 2 : index
    %c0_63 = arith.constant 0 : index
    %c0_64 = arith.constant 0 : index
    %113 = vector.load %arg4[%c2_62, %c0_63, %c0_64] : memref<4x32x32xf32, #tpu.memory_space<vmem>>, vector<1x32x32xf32>
    %114 = vector.shape_cast %113 : vector<1x32x32xf32> to vector<32x32xf32>
    %cst_65 = arith.constant dense<0.000000e+00> : vector<16x32xf32>
    %115 = tpu.matmul %28, %114, %cst_65 {dimension_numbers = #tpu.dot_dimension_numbers<[1], [0], [0], [1], [0, 0, 1, 1], [], []>} : vector<16x32xf32>, vector<32x32xf32>, vector<16x32xf32> -> vector<16x32xf32>
    %116 = vector.extract_strided_slice %2 {offsets = [8, 0], sizes = [1, 32], strides = [1, 1]} : vector<10x32xf32> to vector<1x32xf32>
    %117 = vector.broadcast %116 : vector<1x32xf32> to vector<16x32xf32>
    %118 = arith.addf %115, %117 : vector<16x32xf32>
    %cst_66 = arith.constant dense<0.000000e+00> : vector<16x16xf32>
    %119 = tpu.matmul %105, %112, %cst_66 {dimension_numbers = #tpu.dot_dimension_numbers<[1], [1], [0], [0], [0, 0, 1, 0], [], []>} : vector<16x8xf32>, vector<16x8xf32>, vector<16x16xf32> -> vector<16x16xf32>
    %120 = arith.addf %119, %1 : vector<16x16xf32>
    %cst_67 = arith.constant dense<0xFF800000> : vector<16xf32>
    %121 = vector.multi_reduction <maximumf>, %120, %cst_67 [1] : vector<16x16xf32> to vector<16xf32>
    %122 = vector.shape_cast %121 : vector<16xf32> to vector<16x1xf32>
    %123 = vector.broadcast %122 : vector<16x1xf32> to vector<16x16xf32>
    %124 = arith.subf %120, %123 : vector<16x16xf32>
    %125 = math.exp %124 : vector<16x16xf32>
    %cst_68 = arith.constant dense<0.000000e+00> : vector<16xf32>
    %126 = vector.multi_reduction <add>, %125, %cst_68 [1] : vector<16x16xf32> to vector<16xf32>
    %127 = vector.shape_cast %126 : vector<16xf32> to vector<16x1xf32>
    %128 = tpu.reciprocal %127 {approx = true} : vector<16x1xf32> -> vector<16x1xf32>
    %129 = vector.broadcast %128 : vector<16x1xf32> to vector<16x16xf32>
    %130 = arith.mulf %125, %129 : vector<16x16xf32>
    %cst_69 = arith.constant dense<0.000000e+00> : vector<16x32xf32>
    %131 = tpu.matmul %130, %118, %cst_69 {dimension_numbers = #tpu.dot_dimension_numbers<[1], [0], [0], [1], [0, 0, 1, 1], [], []>} : vector<16x16xf32>, vector<16x32xf32>, vector<16x32xf32> -> vector<16x32xf32>
    %132 = arith.addf %98, %131 : vector<16x32xf32>
    %c3 = arith.constant 3 : index
    %c0_70 = arith.constant 0 : index
    %c0_71 = arith.constant 0 : index
    %133 = vector.load %arg2[%c3, %c0_70, %c0_71] : memref<8x32x8xf32, #tpu.memory_space<vmem>>, vector<1x32x8xf32>
    %134 = vector.shape_cast %133 : vector<1x32x8xf32> to vector<32x8xf32>
    %cst_72 = arith.constant dense<0.000000e+00> : vector<16x8xf32>
    %135 = tpu.matmul %28, %134, %cst_72 {dimension_numbers = #tpu.dot_dimension_numbers<[1], [0], [0], [1], [0, 0, 1, 1], [], []>} : vector<16x32xf32>, vector<32x8xf32>, vector<16x8xf32> -> vector<16x8xf32>
    %c3_73 = arith.constant 3 : index
    %c0_74 = arith.constant 0 : index
    %c0_75 = arith.constant 0 : index
    %136 = vector.load %arg3[%c3_73, %c0_74, %c0_75] : memref<8x1x8xf32, #tpu.memory_space<vmem>>, vector<1x1x8xf32>
    %137 = vector.shape_cast %136 : vector<1x1x8xf32> to vector<1x8xf32>
    %138 = vector.broadcast %137 : vector<1x8xf32> to vector<16x8xf32>
    %139 = arith.addf %135, %138 : vector<16x8xf32>
    %c7 = arith.constant 7 : index
    %c0_76 = arith.constant 0 : index
    %c0_77 = arith.constant 0 : index
    %140 = vector.load %arg2[%c7, %c0_76, %c0_77] : memref<8x32x8xf32, #tpu.memory_space<vmem>>, vector<1x32x8xf32>
    %141 = vector.shape_cast %140 : vector<1x32x8xf32> to vector<32x8xf32>
    %cst_78 = arith.constant dense<0.000000e+00> : vector<16x8xf32>
    %142 = tpu.matmul %28, %141, %cst_78 {dimension_numbers = #tpu.dot_dimension_numbers<[1], [0], [0], [1], [0, 0, 1, 1], [], []>} : vector<16x32xf32>, vector<32x8xf32>, vector<16x8xf32> -> vector<16x8xf32>
    %c7_79 = arith.constant 7 : index
    %c0_80 = arith.constant 0 : index
    %c0_81 = arith.constant 0 : index
    %143 = vector.load %arg3[%c7_79, %c0_80, %c0_81] : memref<8x1x8xf32, #tpu.memory_space<vmem>>, vector<1x1x8xf32>
    %144 = vector.shape_cast %143 : vector<1x1x8xf32> to vector<1x8xf32>
    %145 = vector.broadcast %144 : vector<1x8xf32> to vector<16x8xf32>
    %146 = arith.addf %142, %145 : vector<16x8xf32>
    %c3_82 = arith.constant 3 : index
    %c0_83 = arith.constant 0 : index
    %c0_84 = arith.constant 0 : index
    %147 = vector.load %arg4[%c3_82, %c0_83, %c0_84] : memref<4x32x32xf32, #tpu.memory_space<vmem>>, vector<1x32x32xf32>
    %148 = vector.shape_cast %147 : vector<1x32x32xf32> to vector<32x32xf32>
    %cst_85 = arith.constant dense<0.000000e+00> : vector<16x32xf32>
    %149 = tpu.matmul %28, %148, %cst_85 {dimension_numbers = #tpu.dot_dimension_numbers<[1], [0], [0], [1], [0, 0, 1, 1], [], []>} : vector<16x32xf32>, vector<32x32xf32>, vector<16x32xf32> -> vector<16x32xf32>
    %150 = vector.extract_strided_slice %2 {offsets = [9, 0], sizes = [1, 32], strides = [1, 1]} : vector<10x32xf32> to vector<1x32xf32>
    %151 = vector.broadcast %150 : vector<1x32xf32> to vector<16x32xf32>
    %152 = arith.addf %149, %151 : vector<16x32xf32>
    %cst_86 = arith.constant dense<0.000000e+00> : vector<16x16xf32>
    %153 = tpu.matmul %139, %146, %cst_86 {dimension_numbers = #tpu.dot_dimension_numbers<[1], [1], [0], [0], [0, 0, 1, 0], [], []>} : vector<16x8xf32>, vector<16x8xf32>, vector<16x16xf32> -> vector<16x16xf32>
    %154 = arith.addf %153, %1 : vector<16x16xf32>
    %cst_87 = arith.constant dense<0xFF800000> : vector<16xf32>
    %155 = vector.multi_reduction <maximumf>, %154, %cst_87 [1] : vector<16x16xf32> to vector<16xf32>
    %156 = vector.shape_cast %155 : vector<16xf32> to vector<16x1xf32>
    %157 = vector.broadcast %156 : vector<16x1xf32> to vector<16x16xf32>
    %158 = arith.subf %154, %157 : vector<16x16xf32>
    %159 = math.exp %158 : vector<16x16xf32>
    %cst_88 = arith.constant dense<0.000000e+00> : vector<16xf32>
    %160 = vector.multi_reduction <add>, %159, %cst_88 [1] : vector<16x16xf32> to vector<16xf32>
    %161 = vector.shape_cast %160 : vector<16xf32> to vector<16x1xf32>
    %162 = tpu.reciprocal %161 {approx = true} : vector<16x1xf32> -> vector<16x1xf32>
    %163 = vector.broadcast %162 : vector<16x1xf32> to vector<16x16xf32>
    %164 = arith.mulf %159, %163 : vector<16x16xf32>
    %cst_89 = arith.constant dense<0.000000e+00> : vector<16x32xf32>
    %165 = tpu.matmul %164, %152, %cst_89 {dimension_numbers = #tpu.dot_dimension_numbers<[1], [0], [0], [1], [0, 0, 1, 1], [], []>} : vector<16x16xf32>, vector<16x32xf32>, vector<16x32xf32> -> vector<16x32xf32>
    %166 = arith.addf %132, %165 : vector<16x32xf32>
    %167 = arith.addf %0, %166 : vector<16x32xf32>
    %cst_90 = arith.constant dense<0.000000e+00> : vector<16xf32>
    %168 = vector.multi_reduction <add>, %167, %cst_90 [1] : vector<16x32xf32> to vector<16xf32>
    %169 = vector.shape_cast %168 : vector<16xf32> to vector<16x1xf32>
    %cst_91 = arith.constant 3.200000e+01 : f32
    %170 = vector.broadcast %cst_91 : f32 to vector<16x1xf32>
    %171 = arith.divf %169, %170 : vector<16x1xf32>
    %172 = vector.broadcast %171 : vector<16x1xf32> to vector<16x32xf32>
    %173 = arith.subf %167, %172 : vector<16x32xf32>
    %174 = arith.mulf %173, %173 : vector<16x32xf32>
    %cst_92 = arith.constant dense<0.000000e+00> : vector<16xf32>
    %175 = vector.multi_reduction <add>, %174, %cst_92 [1] : vector<16x32xf32> to vector<16xf32>
    %176 = vector.shape_cast %175 : vector<16xf32> to vector<16x1xf32>
    %cst_93 = arith.constant 0.0322580636 : f32
    %177 = vector.broadcast %cst_93 : f32 to vector<16x1xf32>
    %178 = arith.mulf %176, %177 : vector<16x1xf32>
    %179 = math.sqrt %178 : vector<16x1xf32>
    %cst_94 = arith.constant 9.99999997E-7 : f32
    %180 = vector.broadcast %cst_94 : f32 to vector<16x1xf32>
    %181 = arith.addf %179, %180 : vector<16x1xf32>
    %182 = vector.broadcast %181 : vector<16x1xf32> to vector<16x32xf32>
    %183 = arith.divf %173, %182 : vector<16x32xf32>
    %184 = vector.broadcast %5 : vector<1x32xf32> to vector<16x32xf32>
    %185 = arith.mulf %184, %183 : vector<16x32xf32>
    %186 = vector.broadcast %6 : vector<1x32xf32> to vector<16x32xf32>
    %187 = arith.addf %185, %186 : vector<16x32xf32>
    %c0_95 = arith.constant 0 : index
    %c0_96 = arith.constant 0 : index
    %188 = vector.load %arg6[%c0_95, %c0_96] : memref<33x64xf32, #tpu.memory_space<vmem>>, vector<32x64xf32>
    %c32 = arith.constant 32 : index
    %c0_97 = arith.constant 0 : index
    %189 = vector.load %arg6[%c32, %c0_97] : memref<33x64xf32, #tpu.memory_space<vmem>>, vector<1x64xf32>
    %cst_98 = arith.constant dense<0.000000e+00> : vector<16x64xf32>
    %190 = tpu.matmul %187, %188, %cst_98 {dimension_numbers = #tpu.dot_dimension_numbers<[1], [0], [0], [1], [0, 0, 1, 1], [], []>} : vector<16x32xf32>, vector<32x64xf32>, vector<16x64xf32> -> vector<16x64xf32>
    %191 = vector.broadcast %189 : vector<1x64xf32> to vector<16x64xf32>
    %192 = arith.addf %190, %191 : vector<16x64xf32>
    %cst_99 = arith.constant 0.000000e+00 : f32
    %193 = vector.broadcast %cst_99 : f32 to vector<16x64xf32>
    %194 = arith.maximumf %192, %193 : vector<16x64xf32>
    %c0_100 = arith.constant 0 : index
    %c0_101 = arith.constant 0 : index
    %195 = vector.load %arg7[%c0_100, %c0_101] : memref<64x32xf32, #tpu.memory_space<vmem>>, vector<64x32xf32>
    %cst_102 = arith.constant dense<0.000000e+00> : vector<16x32xf32>
    %196 = tpu.matmul %194, %195, %cst_102 {dimension_numbers = #tpu.dot_dimension_numbers<[1], [0], [0], [1], [0, 0, 1, 1], [], []>} : vector<16x64xf32>, vector<64x32xf32>, vector<16x32xf32> -> vector<16x32xf32>
    %197 = vector.broadcast %8 : vector<1x32xf32> to vector<16x32xf32>
    %198 = arith.addf %196, %197 : vector<16x32xf32>
    %199 = arith.addf %167, %198 : vector<16x32xf32>
    %c0_103 = arith.constant 0 : index
    %c0_104 = arith.constant 0 : index
    %200 = vector.load %arg8[%c0_103, %c0_104] : memref<16x32xf32, #tpu.memory_space<vmem>>, vector<16x32xf32>
    tpu.vector_store %arg8[%c0_103, %c0_104], %199 {strides = array<i32>} : memref<16x32xf32, #tpu.memory_space<vmem>>, vector<16x32xf32>,
    return
  }
}

</mosaic_0001>

<bundles_post_ra>
// kernel: encoder_layer.1
= control target key start
LH: loop header
LB: loop body
LE: loop exit
PB: predicated region body
PF: predicated region fallthrough
CT: control target
= control target key end

     0   :  { %vm36_vm0 = vcmask 261120   ;;  %s3168_s0 = inlined_call_operand.vmem [shape: f32[16,32], index: 0, kind: input, shape index: {}]   ;;  %s3169_s1 = inlined_call_operand.vmem [shape: f32[16,16], index: 1, kind: input, shape index: {}]   ;;  %s3170_s2 = inlined_call_operand.vmem [shape: f32[8,32,8], index: 2, kind: input, shape index: {}]   ;;  %s3171_s3 = inlined_call_operand.vmem [shape: f32[8,1,8], index: 3, kind: input, shape index: {}]   ;;  %s3172_s4 = inlined_call_operand.vmem [shape: f32[4,32,32], index: 4, kind: input, shape index: {}]   ;;  %s3173_s5 = inlined_call_operand.vmem [shape: f32[10,32], index: 5, kind: input, shape index: {}]   ;;  %s3174_s6 = inlined_call_operand.vmem [shape: f32[33,64], index: 6, kind: input, shape index: {}]   ;;  %s3175_s7 = inlined_call_operand.vmem [shape: f32[64,32], index: 7, kind: input, shape index: {}]   ;;  %s3176_s8 = inlined_call_operand.hbm [shape: f32[16,32], index: 8, kind: output, shape index: {}]  }
   0x1   :  { %v2737_v0 = vld [vmem:[%s3168_s0] sm:$0xff]  ;;  %v2742_v1 = vld [vmem:[%s3168_s0 + $0x8] sm:$0xff] }
   0x2   :  { %13 = vsyncpa [#allocation3], 0  ;;  %v37_v2 = vsel %vm36_vm0, %v2737_v0, 0.0  ;;  %v40_v3 = vsel %vm36_vm0, %v2742_v1, 0.0  ;;  %v97_v14 = vld [vmem:[%s3170_s2 + $0x18] sm:$0xff]  ;;  %v96_v16 = vld [vmem:[%s3170_s2 + $0x10] sm:$0xff]  ;;  %v78_v36 = vlaneseq }
   0x3   :  { %38 = vadd.xlane.f32.xlu0 %v37_v2  ;;  %2395 = vmatprep.subr.mxu0 %v97_v14  ;;  %v2173_v15 = vld [vmem:[%s3170_s2 + $0x98] sm:$0xff]  ;;  %v2172_v17 = vld [vmem:[%s3170_s2 + $0x90] sm:$0xff]  ;;  %v95_v18 = vld [vmem:[%s3170_s2 + $0x8] sm:$0xff]  ;;  %vm357_vm5 = vcmask 64512   ;;  %vm445_vm6 = vcmask 130048   ;;  %vm2065_vm11 = vcmask 523264  }
   0x4   :  { %2396 = vmatpush3.msra.mxu0 %v97_v14  ;;  %2406 = vmatprep.subr.mxu1 %v2173_v15  ;;  %v2171_v19 = vld [vmem:[%s3170_s2 + $0x88] sm:$0xff]  ;;  %v94_v20 = vld [vmem:[%s3170_s2] sm:$0xff]  ;;  %v277_v22 = vld [vmem:[%s3172_s4 + $0x18] sm:$0xff]  ;;  %v2787_v40 = vshrl.u32 %v78_v36, 7 }
   0x5   :  { %2397 = vmatprep.subr.mxu0 %v96_v16  ;;  %2407 = vmatpush3.msra.mxu1 %v2173_v15  ;;  %v2170_v21 = vld [vmem:[%s3170_s2 + $0x80] sm:$0xff]  ;;  %v276_v54 = vld [vmem:[%s3172_s4 + $0x10] sm:$0xff]  ;;  %v275_v55 = vld [vmem:[%s3172_s4 + $0x8] sm:$0xff] }
   0x6   :  { %2398 = vmatpush3.msra.mxu0 %v96_v16  ;;  %2408 = vmatprep.subr.mxu1 %v2172_v17  ;;  %v80_v41 = vsub.s32 0, %v2787_v40  ;;  %v2793_v42 = vld [vmem:[%s3173_s5] sm:$0xff]  ;;  %v86_v43 = vsub.s32 1, %v2787_v40  ;;  %v280_v61 = vsub.s32 6, %v2787_v40  ;;  %v2205_v15 = vld [vmem:[%s3172_s4 + $0x38] sm:$0xff]  ;;  %v2204_v16 = vld [vmem:[%s3172_s4 + $0x30] sm:$0xff] }
   0x7   :  { %41 = vadd.xlane.f32.xlu0 %v40_v3  ;;  %2399 = vmatprep.subr.mxu0 %v95_v18  ;;  %v274_v56 = vld [vmem:[%s3172_s4] sm:$0xff] }
   0x8   :  { %2409 = vmatpush3.msra.mxu1 %v2172_v17  ;;  %2400 = vmatpush3.msra.mxu0 %v95_v18  ;;  %v81_v44 = vrot.slane %v2793_v42, %v80_v41  ;;  %v87_v46 = vrot.slane %v2793_v42, %v86_v43  ;;  %v2175_v57 = vld [vmem:[%s3171_s3 + $0x4] ss:$0 sm:$0xff]  ;;  %v2167_v62 = vld [vmem:[%s3171_s3] ss:$0 sm:$0xff]  ;;  %v2203_v17 = vld [vmem:[%s3172_s4 + $0x28] sm:$0xff] }
   0x9   :  { %2410 = vmatprep.subr.mxu1 %v2171_v19  ;;  %2401 = vmatprep.subr.mxu0 %v94_v20  ;;  %v2186_v14 = vld [vmem:[%s3170_s2 + $0x20] sm:$0xff] }
   0xa   :  { %2411 = vmatpush3.msra.mxu1 %v2171_v19  ;;  %2402 = vmatpush3.msra.mxu0 %v94_v20  ;;  %v2202_v18 = vld [vmem:[%s3172_s4 + $0x20] sm:$0xff]  ;;  %v2225_v19 = vld [vmem:[%s3170_s2 + $0xd8] sm:$0xff]  ;;  %v2224_v20 = vld [vmem:[%s3170_s2 + $0xd0] sm:$0xff] }
   0xb   :  { %2412 = vmatprep.subr.mxu1 %v2170_v21  ;;  %2417 = vmatprep.subr.mxu0 %v277_v22 }
   0xc   :  { %2413 = vmatpush3.msra.mxu1 %v2170_v21  ;;  %v2223_v21 = vld [vmem:[%s3170_s2 + $0xc8] sm:$0xff] }
  0x8c   :  { %v39_v4 = vpop.xlane.xlu0 %38 }
  0x8d   :  { %v44_v5 = vmul.f32 0.03125, %v39_v4 }
  0x8f   :  { %v2749_v6 = vsub.f32 %v2737_v0, %v44_v5  ;;  %v281_v5 = vrot.slane %v2793_v42, %v280_v61 }
  0x90   :  { %v42_v7 = vpop.xlane.xlu0 %41 }
  0x91   :  { %v45_v8 = vmul.f32 0.03125, %v42_v7  ;;  %v48_v9 = vmul.f32 %v2749_v6, %v2749_v6 }
  0x93   :  { %v2754_v10 = vsub.f32 %v2742_v1, %v45_v8  ;;  %v50_v11 = vsel %vm36_vm0, %v48_v9, 0.0 }
  0x94   :  { %51 = vadd.xlane.f32.xlu1 %v50_v11 }
  0x95   :  { %v49_v12 = vmul.f32 %v2754_v10, %v2754_v10 }
  0x97   :  { %v53_v13 = vsel %vm36_vm0, %v49_v12, 0.0  ;;  %v2188_v12 = vld [vmem:[%s3170_s2 + $0x30] sm:$0xff] }
  0x98   :  { %54 = vadd.xlane.f32.xlu1 %v53_v13  ;;  %v2187_v13 = vld [vmem:[%s3170_s2 + $0x28] sm:$0xff] }
 0x11d   :  { %v52_v23 = vpop.xlane.xlu1 %51 }
 0x11e   :  { %v56_v24 = vmul.f32 0.032258064, %v52_v23  ;;  %v2894_v23 = vld [vmem:[%s3169_s1 + $0x8] sm:$0xff] }
 0x120   :  { %2616 = vrsqrt.f32 %v56_v24  ;;  %vm60_vm1 = vcmp.eq.f32.partialorder %v56_v24, inf  ;;  %v63_v29 = vand.u32 2147483648, %v56_v24  ;;  %vm62_vm2 = vcmp.eq.f32.partialorder %v56_v24, 0.0 }
 0x121   :  { %v55_v25 = vpop.xlane.xlu1 %54 }
 0x122   :  { %v57_v26 = vmul.f32 0.032258064, %v55_v25  ;;  %v2899_v25 = vld [vmem:[%s3169_s1] sm:$0xff] }
 0x124   :  { %2618 = vrsqrt.f32 %v57_v26  ;;  %vm67_vm3 = vcmp.eq.f32.partialorder %v57_v26, inf  ;;  %v70_v35 = vand.u32 2147483648, %v57_v26  ;;  %vm69_vm4 = vcmp.eq.f32.partialorder %v57_v26, 0.0 }
 0x12d   :  { %v2617_v27 = vpop.eup %2616 }
 0x12e   :  { %v59_v28 = vmul.f32 %v2617_v27, %v56_v24 }
 0x130   :  { %v61_v30 = vsel %vm60_vm1, %v56_v24, %v59_v28 }
 0x131   :  { %v2619_v31 = vpop.eup %2618  ;;  %v64_v32 = vsel %vm62_vm2, %v63_v29, %v61_v30 }
 0x132   :  { %v72_v33 = vadd.f32 1e-06, %v64_v32  ;;  %v66_v34 = vmul.f32 %v2619_v31, %v57_v26  ;;  %v2191_v31 = vld [vmem:[%s3171_s3 + $0x1] ss:$0 sm:$0xff] }
 0x134   :  { %2620 = vrcp.f32 %v72_v33  ;;  %v68_v37 = vsel %vm67_vm3, %v57_v26, %v66_v34 }
 0x135   :  { %v71_v38 = vsel %vm69_vm4, %v70_v35, %v68_v37  ;;  %v2227_v37 = vld [vmem:[%s3171_s3 + $0x6] ss:$0 sm:$0xff] }
 0x136   :  { %v73_v39 = vadd.f32 1e-06, %v71_v38 }
 0x138   :  { %2622 = vrcp.f32 %v73_v39 }
 0x141   :  { %v2621_v45 = vpop.eup %2620 }
 0x142   :  { %v75_v47 = vmul.f32 %v2621_v45, %v2749_v6  ;;  %v2189_v6 = vld [vmem:[%s3170_s2 + $0x38] sm:$0xff] }
 0x144   :  { %v82_v48 = vmul.f32 %v81_v44, %v75_v47 }
 0x145   :  { %v2623_v49 = vpop.eup %2622 }
 0x146   :  { %v2803_v50 = vadd.f32 %v87_v46, %v82_v48  ;;  %v77_v51 = vmul.f32 %v2623_v49, %v2754_v10 }
 0x148   :  { %v83_v52 = vmul.f32 %v81_v44, %v77_v51  ;;  %2403 = vmatprep.mubr.msk.f32.mxu0 %vm36_vm0, %v2803_v50  ;;  %2414 = vmatprep.mubr.msk.f32.mxu1 %vm36_vm0, %v2803_v50 }
 0x14a   :  { %v2810_v53 = vadd.f32 %v87_v46, %v83_v52 }
 0x14c   :  { %2404 = vmatmul.mubr.msk.f32.vlgmr.msra.gmra.mxu0 %vm36_vm0, %v2810_v53  ;;  %2415 = vmatmul.mubr.msk.f32.vlgmr.msra.gmra.mxu1 %vm36_vm0, %v2810_v53 }
 0x14d   :  { %2418 = vmatpush3.msra.mxu0 %v277_v22  ;;  %2425 = vmatprep.mubr.msk.f32.mxu0 %vm36_vm0, %v2803_v50  ;;  %v2222_v22 = vld [vmem:[%s3170_s2 + $0xc0] sm:$0xff] }
 0x14e   :  { %2419 = vmatprep.subr.mxu0 %v276_v54 }
 0x14f   :  { %2420 = vmatpush3.msra.mxu0 %v276_v54 }
 0x150   :  { %2421 = vmatprep.subr.mxu0 %v275_v55 }
 0x151   :  { %2422 = vmatpush3.msra.mxu0 %v275_v55 }
 0x152   :  { %2423 = vmatprep.subr.mxu0 %v274_v56 }
 0x153   :  { %2424 = vmatpush3.msra.mxu0 %v274_v56 }
 0x154   :  { %2426 = vmatmul.mubr.msk.f32.vlgmr.msra.gmra.mxu0 %vm36_vm0, %v2810_v53 }
 0x20c   :  { %v2405_v58 = vpop.f32.mrf.mxu0  ;;  %v2416_v59 = vpop.f32.mrf.mxu1 }
 0x20d   :  { %v271_v60 = vadd.f32 %v2416_v59, %v2175_v57  ;;  %v183_v8 = vadd.f32 %v2405_v58, %v2167_v62  ;;  %v2197_v58 = vld [vmem:[%s3170_s2 + $0xb8] sm:$0xff] }
 0x20e   :  { %v177_v63 = vpop.f32.mrf.mxu0  ;;  %v265_v2 = vpop.f32.mrf.mxu1 }
 0x20f   :  { %v178_v3 = vadd.f32 %v2167_v62, %v177_v63  ;;  %v266_v4 = vadd.f32 %v2175_v57, %v265_v2  ;;  %2428 = vmatprep.subr.msk.mxu1 %vm357_vm5, %v271_v60 }
 0x210   :  { %2429 = vmatpush3.xpose.msk.msra.mxu1 %vm357_vm5, %v271_v60 }
 0x211   :  { %2430 = vmatprep.subr.msk.mxu1 %vm357_vm5, %v266_v4  ;;  %2432 = vmatprep.mubr.msk.f32.mxu1 %vm357_vm5, %v178_v3  ;;  %v2196_v3 = vld [vmem:[%s3170_s2 + $0xb0] sm:$0xff] }
 0x214   :  { %v2427_v7 = vpop.f32.mrf.mxu0  ;;  %2431 = vmatpush3.xpose.msk.msra.mxu1 %vm357_vm5, %v266_v4  ;;  %v2195_v4 = vld [vmem:[%s3170_s2 + $0xa8] sm:$0xff] }
 0x215   :  { %v354_v9 = vadd.f32 %v2427_v7, %v281_v5  ;;  %2442 = vmatprep.subr.mxu1 %v2189_v6 }
 0x216   :  { %v348_v10 = vpop.f32.mrf.mxu0 }
 0x217   :  { %v349_v11 = vadd.f32 %v348_v10, %v281_v5  ;;  %2435 = vmatprep.subr.mxu0 %v354_v9  ;;  %2433 = vmatmul.mubr.msk.f32.vlgmr.msra.gmra.mxu1 %vm357_vm5, %v183_v8  ;;  %v2194_v5 = vld [vmem:[%s3170_s2 + $0xa0] sm:$0xff]  ;;  %v734_v10 = vsub.s32 7, %v2787_v40 }
 0x218   :  { %2436 = vmatpush3.msra.mxu0 %v354_v9  ;;  %2443 = vmatpush3.msra.mxu1 %v2189_v6  ;;  %v2199_v9 = vld [vmem:[%s3171_s3 + $0x5] ss:$0 sm:$0xff] }
 0x219   :  { %2437 = vmatprep.subr.mxu0 %v349_v11  ;;  %2450 = vmatprep.mubr.msk.f32.mxu1 %vm36_vm0, %v2803_v50 }
 0x21a   :  { %2438 = vmatpush3.msra.mxu0 %v349_v11  ;;  %2444 = vmatprep.subr.mxu1 %v2188_v12 }
 0x21b   :  { %2445 = vmatpush3.msra.mxu1 %v2188_v12  ;;  %2453 = vmatprep.subr.mxu0 %v2197_v58 }
 0x21c   :  { %2446 = vmatprep.subr.mxu1 %v2187_v13 }
 0x21d   :  { %2447 = vmatpush3.msra.mxu1 %v2187_v13 }
 0x21e   :  { %2448 = vmatprep.subr.mxu1 %v2186_v14 }
 0x21f   :  { %2449 = vmatpush3.msra.mxu1 %v2186_v14  ;;  %v735_v14 = vrot.slane %v2793_v42, %v734_v10 }
 0x220   :  { %2451 = vmatmul.mubr.msk.f32.vlgmr.msra.gmra.mxu1 %vm36_vm0, %v2810_v53  ;;  %2464 = vmatprep.subr.mxu1 %v2205_v15 }
 0x221   :  { %2465 = vmatpush3.msra.mxu1 %v2205_v15  ;;  %2472 = vmatprep.mubr.msk.f32.mxu1 %vm36_vm0, %v2803_v50 }
 0x222   :  { %2466 = vmatprep.subr.mxu1 %v2204_v16 }
 0x223   :  { %2467 = vmatpush3.msra.mxu1 %v2204_v16 }
 0x224   :  { %2468 = vmatprep.subr.mxu1 %v2203_v17 }
 0x225   :  { %2469 = vmatpush3.msra.mxu1 %v2203_v17 }
 0x226   :  { %2470 = vmatprep.subr.mxu1 %v2202_v18 }
 0x227   :  { %2471 = vmatpush3.msra.mxu1 %v2202_v18 }
 0x228   :  { %2473 = vmatmul.mubr.msk.f32.vlgmr.msra.gmra.mxu1 %vm36_vm0, %v2810_v53  ;;  %2500 = vmatprep.subr.mxu1 %v2225_v19 }
 0x229   :  { %2501 = vmatpush3.msra.mxu1 %v2225_v19  ;;  %2508 = vmatprep.mubr.msk.f32.mxu1 %vm36_vm0, %v2803_v50 }
 0x22a   :  { %2502 = vmatprep.subr.mxu1 %v2224_v20 }
 0x22b   :  { %2503 = vmatpush3.msra.mxu1 %v2224_v20 }
 0x22c   :  { %2504 = vmatprep.subr.mxu1 %v2223_v21 }
 0x22d   :  { %2505 = vmatpush3.msra.mxu1 %v2223_v21 }
 0x22e   :  { %2506 = vmatprep.subr.mxu1 %v2222_v22 }
 0x22f   :  { %2507 = vmatpush3.msra.mxu1 %v2222_v22 }
 0x230   :  { %2509 = vmatmul.mubr.msk.f32.vlgmr.msra.gmra.mxu1 %vm36_vm0, %v2810_v53 }
 0x2d7   :  { %v2434_v24 = vpop.f32.mrf.mxu1 }
 0x2d8   :  { %v442_v26 = vadd.f32 %v2434_v24, %v2894_v23 }
 0x2d9   :  { %v436_v27 = vpop.f32.mrf.mxu1 }
 0x2da   :  { %v437_v28 = vadd.f32 %v436_v27, %v2899_v25  ;;  %v449_v29 = vsel %vm445_vm6, %v442_v26, -inf }
 0x2db   :  { %450 = vmax.xlane.f32.xlu1 %v449_v29 }
 0x2dc   :  { %v446_v30 = vsel %vm445_vm6, %v437_v28, -inf }
 0x2dd   :  { %447 = vmax.xlane.f32.xlu0 %v446_v30 }
 0x2e0   :  { %v2452_v32 = vpop.f32.mrf.mxu1 }
 0x2e1   :  { %v2908_v33 = vadd.f32 %v2452_v32, %v2191_v31 }
 0x2e2   :  { %v630_v34 = vpop.f32.mrf.mxu1 }
 0x2e3   :  { %v631_v6 = vadd.f32 %v2191_v31, %v630_v34 }
 0x2e8   :  { %v2910_v35 = vpop.f32.mrf.mxu1 }
 0x2e9   :  { %v808_v16 = vadd.f32 %v2910_v35, %v735_v14 }
 0x2ea   :  { %v2912_v36 = vpop.f32.mrf.mxu1 }
 0x2eb   :  { %v803_v17 = vadd.f32 %v2912_v36, %v735_v14  ;;  %v2217_v36 = vld [vmem:[%s3170_s2 + $0x58] sm:$0xff]  ;;  %v2242_v14 = vld [vmem:[%s3170_s2 + $0x60] sm:$0xff] }
 0x2f0   :  { %v2510_v38 = vpop.f32.mrf.mxu1 }
 0x2f1   :  { %v1176_v39 = vadd.f32 %v2510_v38, %v2227_v37 }
 0x2f2   :  { %v1170_v44 = vpop.f32.mrf.mxu1 }
 0x2f3   :  { %v1171_v45 = vadd.f32 %v2227_v37, %v1170_v44  ;;  %2522 = vmatprep.subr.msk.mxu1 %vm357_vm5, %v1176_v39 }
 0x2f4   :  { %2523 = vmatpush3.xpose.msk.msra.mxu1 %vm357_vm5, %v1176_v39 }
 0x2f5   :  { %2524 = vmatprep.subr.msk.mxu1 %vm357_vm5, %v1171_v45 }
 0x2f8   :  { %2525 = vmatpush3.xpose.msk.msra.mxu1 %vm357_vm5, %v1171_v45 }
 0x364   :  { %v451_v46 = vpop.xlane.xlu1 %450 }
 0x365   :  { %v453_v47 = vsub.f32 %v442_v26, %v451_v46 }
 0x366   :  { %v448_v48 = vpop.xlane.xlu0 %447 }
 0x367   :  { %v456_v49 = vmul.f32 1.442695, %v453_v47  ;;  %v452_v51 = vsub.f32 %v437_v28, %v448_v48  ;;  %v2216_v47 = vld [vmem:[%s3170_s2 + $0x50] sm:$0xff]  ;;  %v2215_v48 = vld [vmem:[%s3170_s2 + $0x48] sm:$0xff] }
 0x369   :  { %2624 = vpow2.f32 %v456_v49  ;;  %v454_v52 = vmul.f32 1.442695, %v452_v51  ;;  %v2214_v49 = vld [vmem:[%s3170_s2 + $0x40] sm:$0xff]  ;;  %v2233_v51 = vld [vmem:[%s3172_s4 + $0x58] sm:$0xff] }
 0x36b   :  { %2626 = vpow2.f32 %v454_v52  ;;  %v2232_v52 = vld [vmem:[%s3172_s4 + $0x50] sm:$0xff] }
 0x376   :  { %v2625_v54 = vpop.eup %2624 }
 0x377   :  { %v461_v55 = vsel %vm445_vm6, %v2625_v54, 0.0 }
 0x378   :  { %v2627_v56 = vpop.eup %2626  ;;  %462 = vadd.xlane.f32.xlu1 %v461_v55  ;;  %v2230_v55 = vld [vmem:[%s3172_s4 + $0x40] sm:$0xff] }
 0x379   :  { %v458_v57 = vsel %vm445_vm6, %v2627_v56, 0.0 }
 0x37a   :  { %459 = vadd.xlane.f32.xlu0 %v458_v57  ;;  %v92_v57 = vsub.s32 4, %v2787_v40 }
 0x401   :  { %v463_v59 = vpop.xlane.xlu1 %462 }
 0x402   :  { %2628 = vrcp.f32 %v463_v59 }
 0x403   :  { %v460_v60 = vpop.xlane.xlu0 %459 }
 0x404   :  { %2630 = vrcp.f32 %v460_v60 }
 0x40f   :  { %v2629_v61 = vpop.eup %2628 }
 0x410   :  { %v467_v2 = vmul.f32 %v2629_v61, %v2625_v54  ;;  %v2231_v54 = vld [vmem:[%s3172_s4 + $0x48] sm:$0xff] }
 0x411   :  { %v2631_v62 = vpop.eup %2630 }
 0x412   :  { %v466_v63 = vmul.f32 %v2631_v62, %v2627_v56  ;;  %v2245_v56 = vld [vmem:[%s3170_s2 + $0x78] sm:$0xff] }
 0x413   :  { %2536 = vmatprep.subr.mxu1 %v2245_v56 }
 0x414   :  { %2439 = vmatprep.mubr.msk.f32.mxu0 %vm445_vm6, %v466_v63 }
 0x415   :  { %2440 = vmatmul.mubr.msk.f32.vlgmr.msra.gmra.mxu0 %vm445_vm6, %v467_v2 }
 0x416   :  { %2454 = vmatpush3.msra.mxu0 %v2197_v58  ;;  %2461 = vmatprep.mubr.msk.f32.mxu0 %vm36_vm0, %v2803_v50  ;;  %v93_v58 = vrot.slane %v2793_v42, %v92_v57 }
 0x417   :  { %2455 = vmatprep.subr.mxu0 %v2196_v3 }
 0x418   :  { %2456 = vmatpush3.msra.mxu0 %v2196_v3 }
 0x419   :  { %2457 = vmatprep.subr.mxu0 %v2195_v4 }
 0x41a   :  { %2458 = vmatpush3.msra.mxu0 %v2195_v4  ;;  %v2219_v4 = vld [vmem:[%s3171_s3 + $0x2] ss:$0 sm:$0xff] }
 0x41b   :  { %2459 = vmatprep.subr.mxu0 %v2194_v5 }
 0x41c   :  { %2460 = vmatpush3.msra.mxu0 %v2194_v5 }
 0x41d   :  { %2462 = vmatmul.mubr.msk.f32.vlgmr.msra.gmra.mxu0 %vm36_vm0, %v2810_v53 }
 0x41e   :  { %2479 = vmatprep.mubr.msk.f32.mxu0 %vm357_vm5, %v631_v6  ;;  %v35_v6 = vld [vmem:[%s3173_s5 + $0x8] sm:$0x3] }
 0x41f   :  { %v1187_v10 = vrot.slane %v35_v6, %v80_v41 }
 0x4d5   :  { %v2942_v7 = vpop.f32.mrf.mxu0 }
 0x4d6   :  { %v550_v59 = vadd.f32 %v2942_v7, %v93_v58 }
 0x4d7   :  { %v2944_v8 = vpop.f32.mrf.mxu0 }
 0x4d8   :  { %v549_v61 = vadd.f32 %v2944_v8, %v93_v58  ;;  %v2244_v8 = vld [vmem:[%s3170_s2 + $0x70] sm:$0xff] }
 0x4dd   :  { %v2463_v11 = vpop.f32.mrf.mxu0 }
 0x4de   :  { %v724_v12 = vadd.f32 %v2463_v11, %v2199_v9  ;;  %v2243_v11 = vld [vmem:[%s3170_s2 + $0x68] sm:$0xff] }
 0x4df   :  { %v718_v13 = vpop.f32.mrf.mxu0 }
 0x4e0   :  { %v719_v15 = vadd.f32 %v2199_v9, %v718_v13  ;;  %2475 = vmatprep.subr.msk.mxu0 %vm357_vm5, %v724_v12 }
 0x4e1   :  { %2476 = vmatpush3.xpose.msk.msra.mxu0 %vm357_vm5, %v724_v12 }
 0x4e2   :  { %2477 = vmatprep.subr.msk.mxu0 %vm357_vm5, %v719_v15 }
 0x4e5   :  { %2478 = vmatpush3.xpose.msk.msra.mxu0 %vm357_vm5, %v719_v15 }
 0x4e6   :  { %2482 = vmatprep.subr.mxu0 %v808_v16 }
 0x4e8   :  { %2480 = vmatmul.mubr.msk.f32.vlgmr.msra.gmra.mxu0 %vm357_vm5, %v2908_v33 }
 0x4e9   :  { %2483 = vmatpush3.msra.mxu0 %v808_v16  ;;  %v2261_v16 = vld [vmem:[%s3172_s4 + $0x78] sm:$0xff] }
 0x4ea   :  { %2484 = vmatprep.subr.mxu0 %v803_v17 }
 0x4eb   :  { %2485 = vmatpush3.msra.mxu0 %v803_v17  ;;  %v2260_v17 = vld [vmem:[%s3172_s4 + $0x70] sm:$0xff] }
 0x4ec   :  { %2489 = vmatprep.subr.mxu0 %v2217_v36 }
 0x5a8   :  { %v2481_v18 = vpop.f32.mrf.mxu0 }
 0x5a9   :  { %v895_v19 = vadd.f32 %v2481_v18, %v2894_v23  ;;  %v2259_v18 = vld [vmem:[%s3172_s4 + $0x68] sm:$0xff] }
 0x5aa   :  { %v889_v20 = vpop.f32.mrf.mxu0 }
 0x5ab   :  { %v890_v21 = vadd.f32 %v889_v20, %v2899_v25  ;;  %v901_v22 = vsel %vm445_vm6, %v895_v19, -inf }
 0x5ac   :  { %902 = vmax.xlane.f32.xlu1 %v901_v22 }
 0x5ad   :  { %v898_v24 = vsel %vm445_vm6, %v890_v21, -inf }
 0x5ae   :  { %899 = vmax.xlane.f32.xlu0 %v898_v24 }
 0x635   :  { %v903_v26 = vpop.xlane.xlu1 %902 }
 0x636   :  { %v905_v27 = vsub.f32 %v895_v19, %v903_v26  ;;  %v2258_v19 = vld [vmem:[%s3172_s4 + $0x60] sm:$0xff] }
 0x637   :  { %v900_v28 = vpop.xlane.xlu0 %899 }
 0x638   :  { %v908_v29 = vmul.f32 1.442695, %v905_v27  ;;  %v904_v30 = vsub.f32 %v890_v21, %v900_v28  ;;  %v2247_v28 = vld [vmem:[%s3171_s3 + $0x3] ss:$0 sm:$0xff] }
 0x63a   :  { %2632 = vpow2.f32 %v908_v29  ;;  %v906_v31 = vmul.f32 1.442695, %v904_v30 }
 0x63c   :  { %2634 = vpow2.f32 %v906_v31  ;;  %v1639_v31 = vrot.slane %v35_v6, %v86_v43  ;;  %v2255_v6 = vld [vmem:[%s3171_s3 + $0x7] ss:$0 sm:$0xff] }
 0x647   :  { %v2633_v32 = vpop.eup %2632 }
 0x648   :  { %v913_v33 = vsel %vm445_vm6, %v2633_v32, 0.0 }
 0x649   :  { %v2635_v34 = vpop.eup %2634  ;;  %914 = vadd.xlane.f32.xlu1 %v913_v33 }
 0x64a   :  { %v910_v35 = vsel %vm445_vm6, %v2635_v34, 0.0 }
 0x64b   :  { %911 = vadd.xlane.f32.xlu0 %v910_v35 }
 0x6d2   :  { %v915_v37 = vpop.xlane.xlu1 %914 }
 0x6d3   :  { %2636 = vrcp.f32 %v915_v37 }
 0x6d4   :  { %v912_v38 = vpop.xlane.xlu0 %911 }
 0x6d5   :  { %2638 = vrcp.f32 %v912_v38 }
 0x6e0   :  { %v2637_v39 = vpop.eup %2636 }
 0x6e1   :  { %v919_v46 = vmul.f32 %v2637_v39, %v2633_v32 }
 0x6e2   :  { %v2639_v44 = vpop.eup %2638 }
 0x6e3   :  { %v918_v45 = vmul.f32 %v2639_v44, %v2635_v34 }
 0x6e5   :  { %2486 = vmatprep.mubr.msk.f32.mxu0 %vm445_vm6, %v918_v45 }
 0x6e6   :  { %2487 = vmatmul.mubr.msk.f32.vlgmr.msra.gmra.mxu0 %vm445_vm6, %v919_v46 }
 0x6e7   :  { %2490 = vmatpush3.msra.mxu0 %v2217_v36  ;;  %2497 = vmatprep.mubr.msk.f32.mxu0 %vm36_vm0, %v2803_v50 }
 0x6e8   :  { %2491 = vmatprep.subr.mxu0 %v2216_v47 }
 0x6e9   :  { %2492 = vmatpush3.msra.mxu0 %v2216_v47 }
 0x6ea   :  { %2493 = vmatprep.subr.mxu0 %v2215_v48 }
 0x6eb   :  { %2494 = vmatpush3.msra.mxu0 %v2215_v48 }
 0x6ec   :  { %2495 = vmatprep.subr.mxu0 %v2214_v49 }
 0x6ed   :  { %2496 = vmatpush3.msra.mxu0 %v2214_v49 }
 0x6ee   :  { %2498 = vmatmul.mubr.msk.f32.vlgmr.msra.gmra.mxu0 %vm36_vm0, %v2810_v53  ;;  %2511 = vmatprep.subr.mxu0 %v2233_v51 }
 0x6ef   :  { %2512 = vmatpush3.msra.mxu0 %v2233_v51  ;;  %2519 = vmatprep.mubr.msk.f32.mxu0 %vm36_vm0, %v2803_v50  ;;  %v2253_v51 = vld [vmem:[%s3170_s2 + $0xf8] sm:$0xff] }
 0x6f0   :  { %2513 = vmatprep.subr.mxu0 %v2232_v52 }
 0x6f1   :  { %2514 = vmatpush3.msra.mxu0 %v2232_v52 }
 0x6f2   :  { %2515 = vmatprep.subr.mxu0 %v2231_v54 }
 0x6f3   :  { %2516 = vmatpush3.msra.mxu0 %v2231_v54 }
 0x6f4   :  { %2517 = vmatprep.subr.mxu0 %v2230_v55 }
 0x6f5   :  { %2518 = vmatpush3.msra.mxu0 %v2230_v55 }
 0x6f6   :  { %2520 = vmatmul.mubr.msk.f32.vlgmr.msra.gmra.mxu0 %vm36_vm0, %v2810_v53 }
 0x7a6   :  { %v2488_v60 = vpop.f32.mrf.mxu0 }
 0x7a7   :  { %v3006_v62 = vadd.f32 %v2488_v60, %v550_v59  ;;  %v2252_v59 = vld [vmem:[%s3170_s2 + $0xf0] sm:$0xff]  ;;  %v2251_v60 = vld [vmem:[%s3170_s2 + $0xe8] sm:$0xff] }
 0x7a8   :  { %v992_v63 = vpop.f32.mrf.mxu0 }
 0x7a9   :  { %v3008_v2 = vadd.f32 %v992_v63, %v549_v61  ;;  %v2250_v61 = vld [vmem:[%s3170_s2 + $0xe0] sm:$0xff] }
 0x7ae   :  { %v2499_v3 = vpop.f32.mrf.mxu0 }
 0x7af   :  { %v1088_v7 = vadd.f32 %v2499_v3, %v2219_v4 }
 0x7b0   :  { %v1082_v5 = vpop.f32.mrf.mxu0 }
 0x7b1   :  { %v1083_v9 = vadd.f32 %v2219_v4, %v1082_v5 }
 0x7b3   :  { %2526 = vmatprep.mubr.msk.f32.mxu1 %vm357_vm5, %v1083_v9 }
 0x7b4   :  { %2527 = vmatmul.mubr.msk.f32.vlgmr.msra.gmra.mxu1 %vm357_vm5, %v1088_v7 }
 0x7b5   :  { %2537 = vmatpush3.msra.mxu1 %v2245_v56  ;;  %2544 = vmatprep.mubr.msk.f32.mxu1 %vm36_vm0, %v2803_v50 }
 0x7b6   :  { %2538 = vmatprep.subr.mxu1 %v2244_v8  ;;  %v2521_v12 = vpop.f32.mrf.mxu0 }
 0x7b7   :  { %v1260_v13 = vadd.f32 %v2521_v12, %v1187_v10  ;;  %2539 = vmatpush3.msra.mxu1 %v2244_v8 }
 0x7b8   :  { %2540 = vmatprep.subr.mxu1 %v2243_v11  ;;  %v1254_v41 = vpop.f32.mrf.mxu0 }
 0x7b9   :  { %v1255_v15 = vadd.f32 %v1254_v41, %v1187_v10  ;;  %2541 = vmatpush3.msra.mxu1 %v2243_v11  ;;  %2529 = vmatprep.subr.mxu0 %v1260_v13 }
 0x7ba   :  { %2542 = vmatprep.subr.mxu1 %v2242_v14  ;;  %2530 = vmatpush3.msra.mxu0 %v1260_v13 }
 0x7bb   :  { %2543 = vmatpush3.msra.mxu1 %v2242_v14  ;;  %2531 = vmatprep.subr.mxu0 %v1255_v15 }
 0x7bc   :  { %2545 = vmatmul.mubr.msk.f32.vlgmr.msra.gmra.mxu1 %vm36_vm0, %v2810_v53  ;;  %2558 = vmatprep.subr.mxu1 %v2261_v16 }
 0x7bd   :  { %2532 = vmatpush3.msra.mxu0 %v1255_v15  ;;  %2559 = vmatpush3.msra.mxu1 %v2261_v16 }
 0x7be   :  { %2566 = vmatprep.mubr.msk.f32.mxu1 %vm36_vm0, %v2803_v50  ;;  %2560 = vmatprep.subr.mxu1 %v2260_v17 }
 0x7bf   :  { %2561 = vmatpush3.msra.mxu1 %v2260_v17  ;;  %2547 = vmatprep.subr.mxu0 %v2253_v51 }
 0x7c0   :  { %2562 = vmatprep.subr.mxu1 %v2259_v18 }
 0x7c1   :  { %2563 = vmatpush3.msra.mxu1 %v2259_v18 }
 0x7c2   :  { %2564 = vmatprep.subr.mxu1 %v2258_v19 }
 0x7c3   :  { %2565 = vmatpush3.msra.mxu1 %v2258_v19 }
 0x7c4   :  { %2567 = vmatmul.mubr.msk.f32.vlgmr.msra.gmra.mxu1 %vm36_vm0, %v2810_v53 }
 0x874   :  { %v2528_v20 = vpop.f32.mrf.mxu1 }
 0x875   :  { %v1347_v21 = vadd.f32 %v2528_v20, %v2894_v23 }
 0x876   :  { %v1341_v22 = vpop.f32.mrf.mxu1 }
 0x877   :  { %v1342_v24 = vadd.f32 %v1341_v22, %v2899_v25  ;;  %v1353_v26 = vsel %vm445_vm6, %v1347_v21, -inf }
 0x878   :  { %1354 = vmax.xlane.f32.xlu1 %v1353_v26 }
 0x879   :  { %v1350_v27 = vsel %vm445_vm6, %v1342_v24, -inf }
 0x87a   :  { %1351 = vmax.xlane.f32.xlu0 %v1350_v27 }
 0x87c   :  { %v2546_v29 = vpop.f32.mrf.mxu1 }
 0x87d   :  { %v3056_v30 = vadd.f32 %v2546_v29, %v2247_v28 }
 0x87e   :  { %v1534_v32 = vpop.f32.mrf.mxu1 }
 0x87f   :  { %v1535_v63 = vadd.f32 %v2247_v28, %v1534_v32 }
 0x884   :  { %v2568_v33 = vpop.f32.mrf.mxu1 }
 0x885   :  { %v1712_v34 = vadd.f32 %v2568_v33, %v1639_v31 }
 0x886   :  { %v1706_v35 = vpop.f32.mrf.mxu1 }
 0x887   :  { %v1707_v36 = vadd.f32 %v1706_v35, %v1639_v31  ;;  %2576 = vmatprep.subr.mxu1 %v1712_v34 }
 0x888   :  { %2577 = vmatpush3.msra.mxu1 %v1712_v34 }
 0x889   :  { %2578 = vmatprep.subr.mxu1 %v1707_v36 }
 0x88a   :  { %2579 = vmatpush3.msra.mxu1 %v1707_v36 }
 0x901   :  { %v1355_v37 = vpop.xlane.xlu1 %1354 }
 0x902   :  { %v1357_v38 = vsub.f32 %v1347_v21, %v1355_v37 }
 0x903   :  { %v1352_v39 = vpop.xlane.xlu0 %1351 }
 0x904   :  { %v1360_v44 = vmul.f32 1.442695, %v1357_v38  ;;  %v1356_v45 = vsub.f32 %v1342_v24, %v1352_v39 }
 0x906   :  { %2640 = vpow2.f32 %v1360_v44  ;;  %v1358_v46 = vmul.f32 1.442695, %v1356_v45 }
 0x908   :  { %2642 = vpow2.f32 %v1358_v46 }
 0x913   :  { %v2641_v47 = vpop.eup %2640 }
 0x914   :  { %v1365_v43 = vsel %vm445_vm6, %v2641_v47, 0.0 }
 0x915   :  { %v2643_v48 = vpop.eup %2642  ;;  %1366 = vadd.xlane.f32.xlu1 %v1365_v43 }
 0x916   :  { %v1362_v49 = vsel %vm445_vm6, %v2643_v48, 0.0 }
 0x917   :  { %1363 = vadd.xlane.f32.xlu0 %v1362_v49  ;;  %v1963_v49 = vld [vmem:[%s3174_s6 + $0x10] sm:$0xff] }
 0x99e   :  { %v1367_v52 = vpop.xlane.xlu1 %1366 }
 0x99f   :  { %2644 = vrcp.f32 %v1367_v52  ;;  %v1961_v52 = vld [vmem:[%s3174_s6] sm:$0xff] }
 0x9a0   :  { %v1364_v54 = vpop.xlane.xlu0 %1363 }
 0x9a1   :  { %2646 = vrcp.f32 %v1364_v54  ;;  %v2060_v54 = vld [vmem:[%s3175_s7 + $0x38] sm:$0xff] }
 0x9a2   :  { %2594 = vmatprep.subr.mxu1 %v2060_v54 }
 0x9ac   :  { %v2645_v55 = vpop.eup %2644 }
 0x9ad   :  { %v1371_v58 = vmul.f32 %v2645_v55, %v2641_v47  ;;  %v2059_v55 = vld [vmem:[%s3175_s7 + $0x30] sm:$0xff] }
 0x9ae   :  { %v2647_v56 = vpop.eup %2646 }
 0x9af   :  { %v1370_v57 = vmul.f32 %v2647_v56, %v2643_v48  ;;  %v1964_v48 = vld [vmem:[%s3174_s6 + $0x18] sm:$0xff]  ;;  %v2058_v56 = vld [vmem:[%s3175_s7 + $0x28] sm:$0xff] }
 0x9b1   :  { %2533 = vmatprep.mubr.msk.f32.mxu0 %vm445_vm6, %v1370_v57  ;;  %v2057_v57 = vld [vmem:[%s3175_s7 + $0x20] sm:$0xff] }
 0x9b2   :  { %2534 = vmatmul.mubr.msk.f32.vlgmr.msra.gmra.mxu0 %vm445_vm6, %v1371_v58 }
 0x9b3   :  { %2548 = vmatpush3.msra.mxu0 %v2253_v51  ;;  %2555 = vmatprep.mubr.msk.f32.mxu0 %vm36_vm0, %v2803_v50  ;;  %v1962_v51 = vld [vmem:[%s3174_s6 + $0x8] sm:$0xff] }
 0x9b4   :  { %2549 = vmatprep.subr.mxu0 %v2252_v59 }
 0x9b5   :  { %2550 = vmatpush3.msra.mxu0 %v2252_v59 }
 0x9b6   :  { %2551 = vmatprep.subr.mxu0 %v2251_v60 }
 0x9b7   :  { %2552 = vmatpush3.msra.mxu0 %v2251_v60 }
 0x9b8   :  { %2553 = vmatprep.subr.mxu0 %v2250_v61 }
 0x9b9   :  { %2554 = vmatpush3.msra.mxu0 %v2250_v61 }
 0x9ba   :  { %2556 = vmatmul.mubr.msk.f32.vlgmr.msra.gmra.mxu0 %vm36_vm0, %v2810_v53 }
 0x9bb   :  { %2573 = vmatprep.mubr.msk.f32.mxu0 %vm357_vm5, %v1535_v63 }
 0xa72   :  { %v2535_v50 = vpop.f32.mrf.mxu0 }
 0xa73   :  { %v1454_v3 = vadd.f32 %v2535_v50, %v3006_v62 }
 0xa74   :  { %v1444_v4 = vpop.f32.mrf.mxu0 }
 0xa75   :  { %v1453_v5 = vadd.f32 %v1444_v4, %v3008_v2 }
 0xa7a   :  { %v2557_v9 = vpop.f32.mrf.mxu0 }
 0xa7b   :  { %v1628_v7 = vadd.f32 %v2557_v9, %v2255_v6 }
 0xa7c   :  { %v1622_v8 = vpop.f32.mrf.mxu0 }
 0xa7d   :  { %v1623_v10 = vadd.f32 %v2255_v6, %v1622_v8  ;;  %2569 = vmatprep.subr.msk.mxu0 %vm357_vm5, %v1628_v7 }
 0xa7e   :  { %2570 = vmatpush3.xpose.msk.msra.mxu0 %vm357_vm5, %v1628_v7 }
 0xa7f   :  { %2571 = vmatprep.subr.msk.mxu0 %vm357_vm5, %v1623_v10 }
 0xa82   :  { %2572 = vmatpush3.xpose.msk.msra.mxu0 %vm357_vm5, %v1623_v10 }
 0xa83   :  { %2583 = vmatprep.subr.mxu0 %v1964_v48 }
 0xa85   :  { %2574 = vmatmul.mubr.msk.f32.vlgmr.msra.gmra.mxu0 %vm357_vm5, %v3056_v30 }
 0xa86   :  { %2584 = vmatpush3.msra.mxu0 %v1964_v48 }
 0xa87   :  { %2585 = vmatprep.subr.mxu0 %v1963_v49 }
 0xa88   :  { %2586 = vmatpush3.msra.mxu0 %v1963_v49 }
 0xa89   :  { %2587 = vmatprep.subr.mxu0 %v1962_v51 }
 0xa8a   :  { %2588 = vmatpush3.msra.mxu0 %v1962_v51 }
 0xa8b   :  { %2589 = vmatprep.subr.mxu0 %v1961_v52 }
 0xa8c   :  { %2590 = vmatpush3.msra.mxu0 %v1961_v52 }
 0xb45   :  { %v2575_v53 = vpop.f32.mrf.mxu0 }
 0xb46   :  { %v1799_v62 = vadd.f32 %v2575_v53, %v2894_v23 }
 0xb47   :  { %v1793_v2 = vpop.f32.mrf.mxu0 }
 0xb48   :  { %v1794_v11 = vadd.f32 %v1793_v2, %v2899_v25  ;;  %v1805_v12 = vsel %vm445_vm6, %v1799_v62, -inf  ;;  %v1951_v2 = vsub.s32 2, %v2787_v40 }
 0xb49   :  { %1806 = vmax.xlane.f32.xlu1 %v1805_v12 }
 0xb4a   :  { %v1802_v13 = vsel %vm445_vm6, %v1794_v11, -inf }
 0xb4b   :  { %1803 = vmax.xlane.f32.xlu0 %v1802_v13  ;;  %v1952_v13 = vrot.slane %v2793_v42, %v1951_v2 }
 0xbd2   :  { %v1807_v14 = vpop.xlane.xlu1 %1806 }
 0xbd3   :  { %v1809_v41 = vsub.f32 %v1799_v62, %v1807_v14  ;;  %v1957_v14 = vsub.s32 3, %v2787_v40 }
 0xbd4   :  { %v1804_v15 = vpop.xlane.xlu0 %1803 }
 0xbd5   :  { %v1812_v16 = vmul.f32 1.442695, %v1809_v41  ;;  %v1808_v17 = vsub.f32 %v1794_v11, %v1804_v15 }
 0xbd7   :  { %2648 = vpow2.f32 %v1812_v16  ;;  %v1810_v18 = vmul.f32 1.442695, %v1808_v17  ;;  %v1958_v17 = vrot.slane %v2793_v42, %v1957_v14 }
 0xbd9   :  { %2650 = vpow2.f32 %v1810_v18 }
 0xbe4   :  { %v2649_v19 = vpop.eup %2648 }
 0xbe5   :  { %v1817_v23 = vsel %vm445_vm6, %v2649_v19, 0.0 }
 0xbe6   :  { %v2651_v20 = vpop.eup %2650  ;;  %1818 = vadd.xlane.f32.xlu1 %v1817_v23 }
 0xbe7   :  { %v1814_v25 = vsel %vm445_vm6, %v2651_v20, 0.0 }
 0xbe8   :  { %1815 = vadd.xlane.f32.xlu0 %v1814_v25  ;;  %v2055_v25 = vld [vmem:[%s3175_s7 + $0x10] sm:$0xff] }
 0xc6f   :  { %v1819_v21 = vpop.xlane.xlu1 %1818 }
 0xc70   :  { %2652 = vrcp.f32 %v1819_v21  ;;  %v2054_v21 = vld [vmem:[%s3175_s7 + $0x8] sm:$0xff] }
 0xc71   :  { %v1816_v22 = vpop.xlane.xlu0 %1815 }
 0xc72   :  { %2654 = vrcp.f32 %v1816_v22  ;;  %v2053_v22 = vld [vmem:[%s3175_s7] sm:$0xff] }
 0xc7d   :  { %v2653_v24 = vpop.eup %2652 }
 0xc7e   :  { %v1823_v28 = vmul.f32 %v2653_v24, %v2649_v19  ;;  %v2270_v24 = vld [vmem:[%s3174_s6 + $0x20] ss:$0 sm:$0xff] }
 0xc7f   :  { %v2655_v26 = vpop.eup %2654 }
 0xc80   :  { %v1822_v27 = vmul.f32 %v2655_v26, %v2651_v20  ;;  %v2056_v20 = vld [vmem:[%s3175_s7 + $0x18] sm:$0xff]  ;;  %s2686_s7 = smov [#allocation2]  }
 0xc81   :  { %s2156_s29 = sshll.u32 %s2686_s7, 4  ;;  %s2157_s29 = int_to_ptr.vmem [resolvable:$true] %s2156_s29 }
 0xc82   :  { %2580 = vmatprep.mubr.msk.f32.mxu1 %vm445_vm6, %v1822_v27  ;;  %s2664_s6 = scalar_lea.vmem %s2157_s29, 256  ;;  %p2669_p1 = scmp.lt.s32.totalorder %s2157_s29, %s2157_s29 }
 0xc83   :  { %2581 = vmatmul.mubr.msk.f32.vlgmr.msra.gmra.mxu1 %vm445_vm6, %v1823_v28  ;;  %p2665_p0 = scmp.ne.s32.totalorder %s2157_s29, %s2664_s6  ;;  %p2670_p2 = scmp.lt.s32.totalorder %s2664_s6, %s2664_s6 }
 0xc84   :  { %2595 = vmatpush3.msra.mxu1 %v2060_v54 }
 0xc85   :  { %2596 = vmatprep.subr.mxu1 %v2059_v55  ;;  %p2671_p3 = por %p2670_p2, %p2669_p1 }
 0xc86   :  { %2597 = vmatpush3.msra.mxu1 %v2059_v55 }
 0xc87   :  { %2598 = vmatprep.subr.mxu1 %v2058_v56  ;;  %p2672_p4 = pnand %p2671_p3, %p2665_p0 }
 0xc88   :  { %2599 = vmatpush3.msra.mxu1 %v2058_v56 }
 0xc89   :  { %2600 = vmatprep.subr.mxu1 %v2057_v57 }
 0xc8a   :  { %2601 = vmatpush3.msra.mxu1 %v2057_v57 }
 0xc8b   :  { %2602 = vmatprep.subr.mxu1 %v2056_v20 }
 0xc8c   :  { %2603 = vmatpush3.msra.mxu1 %v2056_v20 }
 0xc8d   :  { %2604 = vmatprep.subr.mxu1 %v2055_v25 }
 0xc8e   :  { %2605 = vmatpush3.msra.mxu1 %v2055_v25 }
 0xc8f   :  { %2606 = vmatprep.subr.mxu1 %v2054_v21 }
 0xc90   :  { %2607 = vmatpush3.msra.mxu1 %v2054_v21 }
 0xc91   :  { %2608 = vmatprep.subr.mxu1 %v2053_v22 }
 0xc92   :  { %2609 = vmatpush3.msra.mxu1 %v2053_v22 }
 0xd43   :  { %v2582_v29 = vpop.f32.mrf.mxu1 }
 0xd44   :  { %v1906_v30 = vadd.f32 %v2582_v29, %v1454_v3 }
 0xd45   :  { %v1896_v31 = vpop.f32.mrf.mxu1 }
 0xd46   :  { %v3101_v32 = vadd.f32 %v1906_v30, %v2742_v1  ;;  %v1905_v33 = vadd.f32 %v1896_v31, %v1453_v5 }
 0xd48   :  { %v3104_v34 = vadd.f32 %v1905_v33, %v2737_v0  ;;  %v1912_v35 = vsel %vm36_vm0, %v3101_v32, 0.0  ;;  %v2063_v33 = vsub.s32 5, %v2787_v40 }
 0xd49   :  { %1913 = vadd.xlane.f32.xlu1 %v1912_v35 }
 0xd4a   :  { %v1909_v36 = vsel %vm36_vm0, %v3104_v34, 0.0  ;;  %v2064_v35 = vrot.slane %v2793_v42, %v2063_v33 }
 0xd4b   :  { %1910 = vadd.xlane.f32.xlu0 %v1909_v36 }
 0xdd2   :  { %v1914_v37 = vpop.xlane.xlu1 %1913 }
 0xdd3   :  { %v1916_v38 = vmul.f32 0.03125, %v1914_v37 }
 0xdd4   :  { %v1911_v39 = vpop.xlane.xlu0 %1910 }
 0xdd5   :  { %v1918_v44 = vsub.f32 %v3101_v32, %v1916_v38  ;;  %v1915_v45 = vmul.f32 0.03125, %v1911_v39 }
 0xdd7   :  { %v1917_v1 = vsub.f32 %v3104_v34, %v1915_v45  ;;  %v1920_v46 = vmul.f32 %v1918_v44, %v1918_v44 }
 0xdd9   :  { %v1924_v0 = vsel %vm36_vm0, %v1920_v46, 0.0  ;;  %v1919_v47 = vmul.f32 %v1917_v1, %v1917_v1 }
 0xdda   :  { %1925 = vadd.xlane.f32.xlu1 %v1924_v0 }
 0xddb   :  { %v1921_v43 = vsel %vm36_vm0, %v1919_v47, 0.0 }
 0xddc   :  { %1922 = vadd.xlane.f32.xlu0 %v1921_v43 }
 0xe63   :  { %v1926_v58 = vpop.xlane.xlu1 %1925 }
 0xe64   :  { %v1928_v59 = vmul.f32 0.032258064, %v1926_v58 }
 0xe65   :  { %v1923_v60 = vpop.xlane.xlu0 %1922 }
 0xe66   :  { %2656 = vrsqrt.f32 %v1928_v59  ;;  %v1927_v61 = vmul.f32 0.032258064, %v1923_v60  ;;  %vm1938_vm7 = vcmp.eq.f32.partialorder %v1928_v59, inf  ;;  %v1941_v3 = vand.u32 2147483648, %v1928_v59 }
 0xe67   :  { %vm1940_vm8 = vcmp.eq.f32.partialorder %v1928_v59, 0.0 }
 0xe68   :  { %2658 = vrsqrt.f32 %v1927_v61  ;;  %vm1931_vm9 = vcmp.eq.f32.partialorder %v1927_v61, inf  ;;  %v1934_v8 = vand.u32 2147483648, %v1927_v61  ;;  %vm1933_vm10 = vcmp.eq.f32.partialorder %v1927_v61, 0.0 }
 0xe73   :  { %v2657_v63 = vpop.eup %2656 }
 0xe74   :  { %v1937_v50 = vmul.f32 %v2657_v63, %v1928_v59 }
 0xe75   :  { %v2659_v4 = vpop.eup %2658 }
 0xe76   :  { %v1939_v5 = vsel %vm1938_vm7, %v1928_v59, %v1937_v50  ;;  %v1930_v9 = vmul.f32 %v2659_v4, %v1927_v61 }
 0xe77   :  { %v1942_v6 = vsel %vm1940_vm8, %v1941_v3, %v1939_v5 }
 0xe78   :  { %v1944_v7 = vadd.f32 1e-06, %v1942_v6  ;;  %v1932_v10 = vsel %vm1931_vm9, %v1927_v61, %v1930_v9 }
 0xe79   :  { %v1935_v53 = vsel %vm1933_vm10, %v1934_v8, %v1932_v10 }
 0xe7a   :  { %2660 = vrcp.f32 %v1944_v7  ;;  %v1943_v62 = vadd.f32 1e-06, %v1935_v53 }
 0xe7c   :  { %2662 = vrcp.f32 %v1943_v62 }
 0xe87   :  { %v2661_v11 = vpop.eup %2660 }
 0xe88   :  { %v1948_v12 = vmul.f32 %v2661_v11, %v1918_v44 }
 0xe89   :  { %v2663_v41 = vpop.eup %2662 }
 0xe8a   :  { %v1946_v15 = vmul.f32 %v2663_v41, %v1917_v1  ;;  %v1954_v16 = vmul.f32 %v1952_v13, %v1948_v12 }
 0xe8c   :  { %v1953_v18 = vmul.f32 %v1952_v13, %v1946_v15  ;;  %v1960_v23 = vadd.f32 %v1958_v17, %v1954_v16 }
 0xe8e   :  { %v1959_v19 = vadd.f32 %v1958_v17, %v1953_v18 }
 0xe90   :  { %2591 = vmatprep.mubr.msk.f32.mxu0 %vm36_vm0, %v1959_v19 }
 0xe91   :  { %2592 = vmatmul.mubr.msk.f32.vlgmr.msra.gmra.mxu0 %vm36_vm0, %v1960_v23 }
 0xf51   :  { %v2593_v26 = vpop.f32.mrf.mxu0 }
 0xf52   :  { %v2048_v27 = vadd.f32 %v2593_v26, %v2270_v24 }
 0xf53   :  { %v2042_v28 = vpop.f32.mrf.mxu0 }
 0xf54   :  { %v2043_v29 = vadd.f32 %v2270_v24, %v2042_v28  ;;  %v2052_v31 = vmax.f32 %v2048_v27, 0.0 }
 0xf56   :  { %v2051_v30 = vmax.f32 %v2043_v29, 0.0 }
 0xf58   :  { %2610 = vmatprep.mubr.msk.f32.mxu1 %vm2065_vm11, %v2051_v30 }
 0xf59   :  { %2611 = vmatmul.mubr.msk.f32.vlgmr.msra.gmra.mxu1 %vm2065_vm11, %v2052_v31 }
0x1019   :  { %v2612_v36 = vpop.f32.mrf.mxu1 }
0x101a   :  { %v2144_v37 = vadd.f32 %v2612_v36, %v2064_v35 }
0x101b   :  { %v2138_v38 = vpop.f32.mrf.mxu1 }
0x101c   :  { %v2148_v39 = vadd.f32 %v2144_v37, %v3101_v32  ;;  %v2139_v44 = vadd.f32 %v2138_v38, %v2064_v35 }
0x101e   :  { %2150 = vst.msk [vmem:[#allocation2 + $0x8] sm:$0xff] %vm36_vm0, %v2148_v39  ;;  %v2147_v45 = vadd.f32 %v2139_v44, %v3104_v34 }
0x1020   :  { %2149 = vst.msk [vmem:[#allocation2] sm:$0xff] %vm36_vm0, %v2147_v45 }
0x1021   :  { %2675 = shalt.err (!%p2672_p4)
}
0x1022   :  { %s2687_s30 = smov 128   ;;  %s2688_s2 = smov 8  }
0x1023   :  { %2162 = dma.vmem_to_hbm [thread:$0]  %s2157_s29, 256, %s3176_s8, [#allocation3], %s2687_s30, %s2687_s30, %s2688_s2  }
0x1024   :  { %2684 = dma.done.wait [#allocation3], 256  }
0x1025   :  { %2685 = vsyncadd [#allocation3], 4294967040 }
0x1026   :  { %2166 = vsyncpa [#allocation3], 1 }

</bundles_post_ra>
